<compile_context>
chip_gen: v7x
topology: tpu7x:2x2x1
jax: 0.10.0
libtpu: 0.0.40
codegen_flags: <defaults>
</compile_context>

<pallas_src>
import math
import numpy as np
import jax
import jax.numpy as jnp
from jax import lax
from jax.experimental import pallas as pl
from jax.experimental.pallas import tpu as pltpu


# ----------------------------------------------------------------------------- kernel
def _ufgconv_kernel(x_ref, dstk_ref, mask_ref, w_ref, f1_ref, bias_ref,
                    w2_ref, asrc2_ref, adst2_ref, b2_ref,
                    w3_ref, asrc3_ref, adst3_ref, b3_ref,
                    o_ref):
    N = mask_ref.shape[0]
    dstk = dstk_ref[...]                                                     # (3N, N)
    mask = mask_ref[...]                                                     # (N, N) additive

    # analysis: x0 = x @ W ; batched framelet transform (3N,N)@(N,F) in one MXU call
    x0 = jnp.dot(x_ref[...], w_ref[...], preferred_element_type=jnp.float32)  # (N, F)
    dx = jnp.dot(dstk, x0, preferred_element_type=jnp.float32)                # (3N, F)
    d1x0 = dx[0 * N:1 * N]
    d2x0 = dx[1 * N:2 * N]
    d3x0 = dx[2 * N:3 * N]

    # branch 1: per-node learned filter
    x1 = f1_ref[...] * d1x0                                                   # (N, F)

    # branches 2/3: dense PyG GATConv (heads=1) + ELU; attention dropout is eval-identity
    def gat(xin, w, asrc, adst, b):
        h = jnp.dot(xin, w, preferred_element_type=jnp.float32)               # (N, F) MXU
        a_dst = jnp.sum(h * adst, axis=-1, keepdims=True)                     # (N, 1) VPU+XLU
        a_src = lax.dot_general(asrc, h, (((1,), (1,)), ((), ())),
                                preferred_element_type=jnp.float32)           # (1, N)
        e = a_dst + a_src                                                     # (N, N)
        e = jnp.where(e > 0, e, 0.2 * e)                                      # LeakyReLU(0.2)
        e = e + mask                                                          # -1e30 on non-edges
        m = jnp.max(e, axis=-1, keepdims=True)
        p = jnp.exp(e - m)
        attn = p * pl.reciprocal(jnp.sum(p, axis=-1, keepdims=True))          # softmax (EUP recip)
        out = jnp.dot(attn, h, preferred_element_type=jnp.float32) + b
        return jnp.where(out > 0, out, jnp.exp(out) - 1.0)                    # ELU

    x2 = gat(d2x0, w2_ref[...], asrc2_ref[...], adst2_ref[...], b2_ref[...])
    x3 = gat(d3x0, w3_ref[...], asrc3_ref[...], adst3_ref[...], b3_ref[...])

    # synthesis: out = d1^T @ x1 + d2^T @ x2 + d3^T @ x3 + bias (in-kernel accumulation,
    # contraction over the node axis -- no concat, no transpose copy to HBM)
    cdims = (((0,), (0,)), ((), ()))
    acc = lax.dot_general(dstk[0 * N:1 * N], x1, cdims, preferred_element_type=jnp.float32)
    acc = acc + lax.dot_general(dstk[1 * N:2 * N], x2, cdims, preferred_element_type=jnp.float32)
    acc = acc + lax.dot_general(dstk[2 * N:3 * N], x3, cdims, preferred_element_type=jnp.float32)
    o_ref[...] = acc + bias_ref[...]


# ----------------------------------------------------------------------------- wrapper
def _full_spec(shape):
    # whole-array block (legal: block_shape == full array dims), grid=(1,)
    return pl.BlockSpec(shape, lambda i: tuple(0 for _ in shape))


def ufgconv_forward(x, dstk, mask, params):
    # NOTE: whole working set (< 250 KiB at these shapes) is VMEM-resident on every TPU
    # generation; node-axis tiling / vmem_limit_bytes only needed once N grows to ~1k.
    N = mask.shape[0]
    out_f = params["weight"].shape[1]
    args = (
        x, dstk, mask,
        params["weight"], params["filter1"], params["bias"],
        params["w_gat2"], params["asrc2"], params["adst2"], params["b_gat2"],
        params["w_gat3"], params["asrc3"], params["adst3"], params["b_gat3"],
    )
    return pl.pallas_call(
        _ufgconv_kernel,
        out_shape=jax.ShapeDtypeStruct((N, out_f), jnp.float32),
        grid=(1,),
        in_specs=[_full_spec(a.shape) for a in args],
        out_specs=_full_spec((N, out_f)),
        compiler_params=pltpu.CompilerParams(dimension_semantics=("arbitrary",)),
    )(*args)


# ----------------------------------------------------------------------------- reference
def ufgconv_reference(x, d1, d2, d3, adj, p):
    x0 = x @ p["weight"]

    def gat(xin, w, asrc, adst, b):
        h = xin @ w
        e = (h * adst).sum(-1, keepdims=True) + (h * asrc).sum(-1)[None, :]
        e = jnp.where(e > 0, e, 0.2 * e)
        e = jnp.where(adj > 0, e, -1e30)
        attn = jax.nn.softmax(e, axis=-1)
        out = attn @ h + b
        return jnp.where(out > 0, out, jnp.exp(out) - 1.0)

    x1 = p["filter1"] * (d1 @ x0)
    x2 = gat(d2 @ x0, p["w_gat2"], p["asrc2"], p["adst2"], p["b_gat2"])
    x3 = gat(d3 @ x0, p["w_gat3"], p["asrc3"], p["adst3"], p["b_gat3"])
    dcat = jnp.concatenate([d1, d2, d3], axis=0)
    xcat = jnp.concatenate([x1, x2, x3], axis=0)
    return dcat.T @ xcat + p["bias"]


# ----------------------------------------------------------------------------- main
if __name__ == "__main__":
    N, IN_F, OUT_F = 64, 16, 32   # num_nodes, in_features, out_features (r=2, Lev=2)

    key = jax.random.PRNGKey(0)
    ks = jax.random.split(key, 16)

    def xavier(k, shape):
        lim = math.sqrt(6.0 / (shape[0] + shape[1]))
        return jax.random.uniform(k, shape, jnp.float32, -lim, lim)

    params = {
        "weight":  xavier(ks[0], (IN_F, OUT_F)),
        "filter1": jax.random.uniform(ks[1], (N, 1), jnp.float32, 0.9, 1.1),
        "bias":    jnp.zeros((1, OUT_F), jnp.float32),
        # GATconv2 / GATconv3 parameters (heads=1): lin weight, att_src, att_dst, bias
        "w_gat2":  xavier(ks[2], (OUT_F, OUT_F)),
        "asrc2":   xavier(ks[3], (1, OUT_F)),
        "adst2":   xavier(ks[4], (1, OUT_F)),
        "b_gat2":  jnp.zeros((1, OUT_F), jnp.float32),
        "w_gat3":  xavier(ks[5], (OUT_F, OUT_F)),
        "asrc3":   xavier(ks[6], (1, OUT_F)),
        "adst3":   xavier(ks[7], (1, OUT_F)),
        "b_gat3":  jnp.zeros((1, OUT_F), jnp.float32),
    }

    # node features
    x = jax.random.normal(ks[8], (N, IN_F), jnp.float32)

    # dense stand-ins for the sparse framelet transform matrices d_list[1..3]
    def sparse_like(k, density=0.1):
        kv, km = jax.random.split(k)
        vals = jax.random.normal(kv, (N, N), jnp.float32) * 0.2
        m = jax.random.bernoulli(km, density, (N, N))
        return jnp.where(m, vals, 0.0) + 0.5 * jnp.eye(N, dtype=jnp.float32)

    d1 = sparse_like(ks[9])
    d2 = sparse_like(ks[10])
    d3 = sparse_like(ks[11])

    # dense adjacency from a random edge_index, with self loops (PyG GATConv default);
    # adj[dst, src] = 1 means an edge src -> dst
    adj = (jax.random.bernoulli(ks[12], 0.1, (N, N))).astype(jnp.float32)
    adj = jnp.maximum(adj, jnp.eye(N, dtype=jnp.float32))

    # host-side one-time prep for the fused kernel: stacked framelet operand + additive mask
    dstk = jnp.concatenate([d1, d2, d3], axis=0)            # (3N, N)
    mask = jnp.where(adj > 0, 0.0, -1e30).astype(jnp.float32)

    fwd = jax.jit(ufgconv_forward)
    out = jax.block_until_ready(fwd(x, dstk, mask, params))
    ref = jax.block_until_ready(ufgconv_reference(x, d1, d2, d3, adj, params))

    np.testing.assert_allclose(np.asarray(out), np.asarray(ref), rtol=1e-4, atol=1e-4)
    assert out.shape == (N, OUT_F) and out.dtype == jnp.float32
    print("KERNEL_OK")
</pallas_src>

<mosaic_0001>
module attributes {stable_mosaic.version = 11 : i64} {
  func.func @_ufgconv_kernel(%arg0: i32, %arg1: memref<64x16xf32, #tpu.memory_space<vmem>>, %arg2: memref<192x64xf32, #tpu.memory_space<vmem>>, %arg3: memref<64x64xf32, #tpu.memory_space<vmem>>, %arg4: memref<16x32xf32, #tpu.memory_space<vmem>>, %arg5: memref<64x1xf32, #tpu.memory_space<vmem>>, %arg6: memref<1x32xf32, #tpu.memory_space<vmem>>, %arg7: memref<32x32xf32, #tpu.memory_space<vmem>>, %arg8: memref<1x32xf32, #tpu.memory_space<vmem>>, %arg9: memref<1x32xf32, #tpu.memory_space<vmem>>, %arg10: memref<1x32xf32, #tpu.memory_space<vmem>>, %arg11: memref<32x32xf32, #tpu.memory_space<vmem>>, %arg12: memref<1x32xf32, #tpu.memory_space<vmem>>, %arg13: memref<1x32xf32, #tpu.memory_space<vmem>>, %arg14: memref<1x32xf32, #tpu.memory_space<vmem>>, %arg15: memref<64x32xf32, #tpu.memory_space<vmem>>) attributes {dimension_semantics = [#tpu.dimension_semantics<arbitrary>], iteration_bounds = array<i64: 1>, scalar_prefetch = 0 : i64, scratch_operands = 0 : i64, tpu.core_type = #tpu.core_type<tc>, window_params = [{pipeline_mode = #tpu.pipeline_mode<synchronous>, transform_indices = @transform_0, window_bounds = array<i64: 64, 16>}, {pipeline_mode = #tpu.pipeline_mode<synchronous>, transform_indices = @transform_1, window_bounds = array<i64: 192, 64>}, {pipeline_mode = #tpu.pipeline_mode<synchronous>, transform_indices = @transform_2, window_bounds = array<i64: 64, 64>}, {pipeline_mode = #tpu.pipeline_mode<synchronous>, transform_indices = @transform_3, window_bounds = array<i64: 16, 32>}, {pipeline_mode = #tpu.pipeline_mode<synchronous>, transform_indices = @transform_4, window_bounds = array<i64: 64, 1>}, {pipeline_mode = #tpu.pipeline_mode<synchronous>, transform_indices = @transform_5, window_bounds = array<i64: 1, 32>}, {pipeline_mode = #tpu.pipeline_mode<synchronous>, transform_indices = @transform_6, window_bounds = array<i64: 32, 32>}, {pipeline_mode = #tpu.pipeline_mode<synchronous>, transform_indices = @transform_7, window_bounds = array<i64: 1, 32>}, {pipeline_mode = #tpu.pipeline_mode<synchronous>, transform_indices = @transform_8, window_bounds = array<i64: 1, 32>}, {pipeline_mode = #tpu.pipeline_mode<synchronous>, transform_indices = @transform_9, window_bounds = array<i64: 1, 32>}, {pipeline_mode = #tpu.pipeline_mode<synchronous>, transform_indices = @transform_10, window_bounds = array<i64: 32, 32>}, {pipeline_mode = #tpu.pipeline_mode<synchronous>, transform_indices = @transform_11, window_bounds = array<i64: 1, 32>}, {pipeline_mode = #tpu.pipeline_mode<synchronous>, transform_indices = @transform_12, window_bounds = array<i64: 1, 32>}, {pipeline_mode = #tpu.pipeline_mode<synchronous>, transform_indices = @transform_13, window_bounds = array<i64: 1, 32>}, {pipeline_mode = #tpu.pipeline_mode<synchronous>, transform_indices = @transform_14, window_bounds = array<i64: 64, 32>}]} {
    %c0 = arith.constant 0 : index
    %c0_0 = arith.constant 0 : index
    %0 = vector.load %arg2[%c0, %c0_0] : memref<192x64xf32, #tpu.memory_space<vmem>>, vector<192x64xf32>
    %c0_1 = arith.constant 0 : index
    %c0_2 = arith.constant 0 : index
    %1 = vector.load %arg3[%c0_1, %c0_2] : memref<64x64xf32, #tpu.memory_space<vmem>>, vector<64x64xf32>
    %c0_3 = arith.constant 0 : index
    %c0_4 = arith.constant 0 : index
    %2 = vector.load %arg1[%c0_3, %c0_4] : memref<64x16xf32, #tpu.memory_space<vmem>>, vector<64x16xf32>
    %c0_5 = arith.constant 0 : index
    %c0_6 = arith.constant 0 : index
    %3 = vector.load %arg4[%c0_5, %c0_6] : memref<16x32xf32, #tpu.memory_space<vmem>>, vector<16x32xf32>
    %cst = arith.constant dense<0.000000e+00> : vector<64x32xf32>
    %4 = tpu.matmul %2, %3, %cst {dimension_numbers = #tpu.dot_dimension_numbers<[1], [0], [0], [1], [0, 0, 1, 1], [], []>} : vector<64x16xf32>, vector<16x32xf32>, vector<64x32xf32> -> vector<64x32xf32>
    %cst_7 = arith.constant dense<0.000000e+00> : vector<192x32xf32>
    %5 = tpu.matmul %0, %4, %cst_7 {dimension_numbers = #tpu.dot_dimension_numbers<[1], [0], [0], [1], [0, 0, 1, 1], [], []>} : vector<192x64xf32>, vector<64x32xf32>, vector<192x32xf32> -> vector<192x32xf32>
    %6 = vector.extract_strided_slice %5 {offsets = [0, 0], sizes = [64, 32], strides = [1, 1]} : vector<192x32xf32> to vector<64x32xf32>
    %7 = vector.extract_strided_slice %5 {offsets = [64, 0], sizes = [64, 32], strides = [1, 1]} : vector<192x32xf32> to vector<64x32xf32>
    %8 = vector.extract_strided_slice %5 {offsets = [128, 0], sizes = [64, 32], strides = [1, 1]} : vector<192x32xf32> to vector<64x32xf32>
    %c0_8 = arith.constant 0 : index
    %c0_9 = arith.constant 0 : index
    %9 = vector.load %arg5[%c0_8, %c0_9] : memref<64x1xf32, #tpu.memory_space<vmem>>, vector<64x1xf32>
    %10 = vector.broadcast %9 : vector<64x1xf32> to vector<64x32xf32>
    %11 = arith.mulf %10, %6 : vector<64x32xf32>
    %c0_10 = arith.constant 0 : index
    %c0_11 = arith.constant 0 : index
    %12 = vector.load %arg7[%c0_10, %c0_11] : memref<32x32xf32, #tpu.memory_space<vmem>>, vector<32x32xf32>
    %c0_12 = arith.constant 0 : index
    %c0_13 = arith.constant 0 : index
    %13 = vector.load %arg8[%c0_12, %c0_13] : memref<1x32xf32, #tpu.memory_space<vmem>>, vector<1x32xf32>
    %c0_14 = arith.constant 0 : index
    %c0_15 = arith.constant 0 : index
    %14 = vector.load %arg9[%c0_14, %c0_15] : memref<1x32xf32, #tpu.memory_space<vmem>>, vector<1x32xf32>
    %c0_16 = arith.constant 0 : index
    %c0_17 = arith.constant 0 : index
    %15 = vector.load %arg10[%c0_16, %c0_17] : memref<1x32xf32, #tpu.memory_space<vmem>>, vector<1x32xf32>
    %cst_18 = arith.constant dense<0.000000e+00> : vector<64x32xf32>
    %16 = tpu.matmul %7, %12, %cst_18 {dimension_numbers = #tpu.dot_dimension_numbers<[1], [0], [0], [1], [0, 0, 1, 1], [], []>} : vector<64x32xf32>, vector<32x32xf32>, vector<64x32xf32> -> vector<64x32xf32>
    %17 = vector.broadcast %14 : vector<1x32xf32> to vector<64x32xf32>
    %18 = arith.mulf %16, %17 : vector<64x32xf32>
    %cst_19 = arith.constant dense<0.000000e+00> : vector<64xf32>
    %19 = vector.multi_reduction <add>, %18, %cst_19 [1] : vector<64x32xf32> to vector<64xf32>
    %20 = vector.shape_cast %19 : vector<64xf32> to vector<64x1xf32>
    %cst_20 = arith.constant dense<0.000000e+00> : vector<1x64xf32>
    %21 = tpu.matmul %13, %16, %cst_20 {dimension_numbers = #tpu.dot_dimension_numbers<[1], [1], [0], [0], [0, 0, 1, 0], [], []>} : vector<1x32xf32>, vector<64x32xf32>, vector<1x64xf32> -> vector<1x64xf32>
    %22 = vector.broadcast %20 : vector<64x1xf32> to vector<64x64xf32>
    %23 = vector.broadcast %21 : vector<1x64xf32> to vector<64x64xf32>
    %24 = arith.addf %22, %23 : vector<64x64xf32>
    %cst_21 = arith.constant 0.000000e+00 : f32
    %25 = vector.broadcast %cst_21 : f32 to vector<64x64xf32>
    %26 = arith.cmpf ogt, %24, %25 : vector<64x64xf32>
    %cst_22 = arith.constant 2.000000e-01 : f32
    %27 = vector.broadcast %cst_22 : f32 to vector<64x64xf32>
    %28 = arith.mulf %27, %24 : vector<64x64xf32>
    %29 = arith.select %26, %24, %28 : vector<64x64xi1>, vector<64x64xf32>
    %30 = arith.addf %29, %1 : vector<64x64xf32>
    %cst_23 = arith.constant dense<0xFF800000> : vector<64xf32>
    %31 = vector.multi_reduction <maximumf>, %30, %cst_23 [1] : vector<64x64xf32> to vector<64xf32>
    %32 = vector.shape_cast %31 : vector<64xf32> to vector<64x1xf32>
    %33 = vector.broadcast %32 : vector<64x1xf32> to vector<64x64xf32>
    %34 = arith.subf %30, %33 : vector<64x64xf32>
    %35 = math.exp %34 : vector<64x64xf32>
    %cst_24 = arith.constant dense<0.000000e+00> : vector<64xf32>
    %36 = vector.multi_reduction <add>, %35, %cst_24 [1] : vector<64x64xf32> to vector<64xf32>
    %37 = vector.shape_cast %36 : vector<64xf32> to vector<64x1xf32>
    %38 = tpu.reciprocal %37 : vector<64x1xf32> -> vector<64x1xf32>
    %39 = vector.broadcast %38 : vector<64x1xf32> to vector<64x64xf32>
    %40 = arith.mulf %35, %39 : vector<64x64xf32>
    %cst_25 = arith.constant dense<0.000000e+00> : vector<64x32xf32>
    %41 = tpu.matmul %40, %16, %cst_25 {dimension_numbers = #tpu.dot_dimension_numbers<[1], [0], [0], [1], [0, 0, 1, 1], [], []>} : vector<64x64xf32>, vector<64x32xf32>, vector<64x32xf32> -> vector<64x32xf32>
    %42 = vector.broadcast %15 : vector<1x32xf32> to vector<64x32xf32>
    %43 = arith.addf %41, %42 : vector<64x32xf32>
    %cst_26 = arith.constant 0.000000e+00 : f32
    %44 = vector.broadcast %cst_26 : f32 to vector<64x32xf32>
    %45 = arith.cmpf ogt, %43, %44 : vector<64x32xf32>
    %46 = math.exp %43 : vector<64x32xf32>
    %cst_27 = arith.constant 1.000000e+00 : f32
    %47 = vector.broadcast %cst_27 : f32 to vector<64x32xf32>
    %48 = arith.subf %46, %47 : vector<64x32xf32>
    %49 = arith.select %45, %43, %48 : vector<64x32xi1>, vector<64x32xf32>
    %c0_28 = arith.constant 0 : index
    %c0_29 = arith.constant 0 : index
    %50 = vector.load %arg11[%c0_28, %c0_29] : memref<32x32xf32, #tpu.memory_space<vmem>>, vector<32x32xf32>
    %c0_30 = arith.constant 0 : index
    %c0_31 = arith.constant 0 : index
    %51 = vector.load %arg12[%c0_30, %c0_31] : memref<1x32xf32, #tpu.memory_space<vmem>>, vector<1x32xf32>
    %c0_32 = arith.constant 0 : index
    %c0_33 = arith.constant 0 : index
    %52 = vector.load %arg13[%c0_32, %c0_33] : memref<1x32xf32, #tpu.memory_space<vmem>>, vector<1x32xf32>
    %c0_34 = arith.constant 0 : index
    %c0_35 = arith.constant 0 : index
    %53 = vector.load %arg14[%c0_34, %c0_35] : memref<1x32xf32, #tpu.memory_space<vmem>>, vector<1x32xf32>
    %cst_36 = arith.constant dense<0.000000e+00> : vector<64x32xf32>
    %54 = tpu.matmul %8, %50, %cst_36 {dimension_numbers = #tpu.dot_dimension_numbers<[1], [0], [0], [1], [0, 0, 1, 1], [], []>} : vector<64x32xf32>, vector<32x32xf32>, vector<64x32xf32> -> vector<64x32xf32>
    %55 = vector.broadcast %52 : vector<1x32xf32> to vector<64x32xf32>
    %56 = arith.mulf %54, %55 : vector<64x32xf32>
    %cst_37 = arith.constant dense<0.000000e+00> : vector<64xf32>
    %57 = vector.multi_reduction <add>, %56, %cst_37 [1] : vector<64x32xf32> to vector<64xf32>
    %58 = vector.shape_cast %57 : vector<64xf32> to vector<64x1xf32>
    %cst_38 = arith.constant dense<0.000000e+00> : vector<1x64xf32>
    %59 = tpu.matmul %51, %54, %cst_38 {dimension_numbers = #tpu.dot_dimension_numbers<[1], [1], [0], [0], [0, 0, 1, 0], [], []>} : vector<1x32xf32>, vector<64x32xf32>, vector<1x64xf32> -> vector<1x64xf32>
    %60 = vector.broadcast %58 : vector<64x1xf32> to vector<64x64xf32>
    %61 = vector.broadcast %59 : vector<1x64xf32> to vector<64x64xf32>
    %62 = arith.addf %60, %61 : vector<64x64xf32>
    %cst_39 = arith.constant 0.000000e+00 : f32
    %63 = vector.broadcast %cst_39 : f32 to vector<64x64xf32>
    %64 = arith.cmpf ogt, %62, %63 : vector<64x64xf32>
    %cst_40 = arith.constant 2.000000e-01 : f32
    %65 = vector.broadcast %cst_40 : f32 to vector<64x64xf32>
    %66 = arith.mulf %65, %62 : vector<64x64xf32>
    %67 = arith.select %64, %62, %66 : vector<64x64xi1>, vector<64x64xf32>
    %68 = arith.addf %67, %1 : vector<64x64xf32>
    %cst_41 = arith.constant dense<0xFF800000> : vector<64xf32>
    %69 = vector.multi_reduction <maximumf>, %68, %cst_41 [1] : vector<64x64xf32> to vector<64xf32>
    %70 = vector.shape_cast %69 : vector<64xf32> to vector<64x1xf32>
    %71 = vector.broadcast %70 : vector<64x1xf32> to vector<64x64xf32>
    %72 = arith.subf %68, %71 : vector<64x64xf32>
    %73 = math.exp %72 : vector<64x64xf32>
    %cst_42 = arith.constant dense<0.000000e+00> : vector<64xf32>
    %74 = vector.multi_reduction <add>, %73, %cst_42 [1] : vector<64x64xf32> to vector<64xf32>
    %75 = vector.shape_cast %74 : vector<64xf32> to vector<64x1xf32>
    %76 = tpu.reciprocal %75 : vector<64x1xf32> -> vector<64x1xf32>
    %77 = vector.broadcast %76 : vector<64x1xf32> to vector<64x64xf32>
    %78 = arith.mulf %73, %77 : vector<64x64xf32>
    %cst_43 = arith.constant dense<0.000000e+00> : vector<64x32xf32>
    %79 = tpu.matmul %78, %54, %cst_43 {dimension_numbers = #tpu.dot_dimension_numbers<[1], [0], [0], [1], [0, 0, 1, 1], [], []>} : vector<64x64xf32>, vector<64x32xf32>, vector<64x32xf32> -> vector<64x32xf32>
    %80 = vector.broadcast %53 : vector<1x32xf32> to vector<64x32xf32>
    %81 = arith.addf %79, %80 : vector<64x32xf32>
    %cst_44 = arith.constant 0.000000e+00 : f32
    %82 = vector.broadcast %cst_44 : f32 to vector<64x32xf32>
    %83 = arith.cmpf ogt, %81, %82 : vector<64x32xf32>
    %84 = math.exp %81 : vector<64x32xf32>
    %cst_45 = arith.constant 1.000000e+00 : f32
    %85 = vector.broadcast %cst_45 : f32 to vector<64x32xf32>
    %86 = arith.subf %84, %85 : vector<64x32xf32>
    %87 = arith.select %83, %81, %86 : vector<64x32xi1>, vector<64x32xf32>
    %88 = vector.extract_strided_slice %0 {offsets = [0, 0], sizes = [64, 64], strides = [1, 1]} : vector<192x64xf32> to vector<64x64xf32>
    %cst_46 = arith.constant dense<0.000000e+00> : vector<64x32xf32>
    %89 = tpu.matmul %88, %11, %cst_46 {dimension_numbers = #tpu.dot_dimension_numbers<[0], [0], [1], [1], [0, 1, 1, 1], [], []>} : vector<64x64xf32>, vector<64x32xf32>, vector<64x32xf32> -> vector<64x32xf32>
    %90 = vector.extract_strided_slice %0 {offsets = [64, 0], sizes = [64, 64], strides = [1, 1]} : vector<192x64xf32> to vector<64x64xf32>
    %cst_47 = arith.constant dense<0.000000e+00> : vector<64x32xf32>
    %91 = tpu.matmul %90, %49, %cst_47 {dimension_numbers = #tpu.dot_dimension_numbers<[0], [0], [1], [1], [0, 1, 1, 1], [], []>} : vector<64x64xf32>, vector<64x32xf32>, vector<64x32xf32> -> vector<64x32xf32>
    %92 = arith.addf %89, %91 : vector<64x32xf32>
    %93 = vector.extract_strided_slice %0 {offsets = [128, 0], sizes = [64, 64], strides = [1, 1]} : vector<192x64xf32> to vector<64x64xf32>
    %cst_48 = arith.constant dense<0.000000e+00> : vector<64x32xf32>
    %94 = tpu.matmul %93, %87, %cst_48 {dimension_numbers = #tpu.dot_dimension_numbers<[0], [0], [1], [1], [0, 1, 1, 1], [], []>} : vector<64x64xf32>, vector<64x32xf32>, vector<64x32xf32> -> vector<64x32xf32>
    %95 = arith.addf %92, %94 : vector<64x32xf32>
    %c0_49 = arith.constant 0 : index
    %c0_50 = arith.constant 0 : index
    %96 = vector.load %arg6[%c0_49, %c0_50] : memref<1x32xf32, #tpu.memory_space<vmem>>, vector<1x32xf32>
    %97 = vector.broadcast %96 : vector<1x32xf32> to vector<64x32xf32>
    %98 = arith.addf %95, %97 : vector<64x32xf32>
    %c0_51 = arith.constant 0 : index
    %c0_52 = arith.constant 0 : index
    %99 = vector.load %arg15[%c0_51, %c0_52] : memref<64x32xf32, #tpu.memory_space<vmem>>, vector<64x32xf32>
    tpu.vector_store %arg15[%c0_51, %c0_52], %98 {strides = array<i32>} : memref<64x32xf32, #tpu.memory_space<vmem>>, vector<64x32xf32>,
    return
  }
  func.func @transform_0(%arg0: i32) -> (i32, i32) {
    %c0_i32 = arith.constant 0 : i32
    %c0_i32_0 = arith.constant 0 : i32
    %c0_i32_1 = arith.constant 0 : i32
    return %c0_i32, %c0_i32_0 : i32, i32
  }
  func.func @transform_1(%arg0: i32) -> (i32, i32) {
    %c0_i32 = arith.constant 0 : i32
    %c0_i32_0 = arith.constant 0 : i32
    %c0_i32_1 = arith.constant 0 : i32
    return %c0_i32, %c0_i32_0 : i32, i32
  }
  func.func @transform_2(%arg0: i32) -> (i32, i32) {
    %c0_i32 = arith.constant 0 : i32
    %c0_i32_0 = arith.constant 0 : i32
    %c0_i32_1 = arith.constant 0 : i32
    return %c0_i32, %c0_i32_0 : i32, i32
  }
  func.func @transform_3(%arg0: i32) -> (i32, i32) {
    %c0_i32 = arith.constant 0 : i32
    %c0_i32_0 = arith.constant 0 : i32
    %c0_i32_1 = arith.constant 0 : i32
    return %c0_i32, %c0_i32_0 : i32, i32
  }
  func.func @transform_4(%arg0: i32) -> (i32, i32) {
    %c0_i32 = arith.constant 0 : i32
    %c0_i32_0 = arith.constant 0 : i32
    %c0_i32_1 = arith.constant 0 : i32
    return %c0_i32, %c0_i32_0 : i32, i32
  }
  func.func @transform_5(%arg0: i32) -> (i32, i32) {
    %c0_i32 = arith.constant 0 : i32
    %c0_i32_0 = arith.constant 0 : i32
    %c0_i32_1 = arith.constant 0 : i32
    return %c0_i32, %c0_i32_0 : i32, i32
  }
  func.func @transform_6(%arg0: i32) -> (i32, i32) {
    %c0_i32 = arith.constant 0 : i32
    %c0_i32_0 = arith.constant 0 : i32
    %c0_i32_1 = arith.constant 0 : i32
    return %c0_i32, %c0_i32_0 : i32, i32
  }
  func.func @transform_7(%arg0: i32) -> (i32, i32) {
    %c0_i32 = arith.constant 0 : i32
    %c0_i32_0 = arith.constant 0 : i32
    %c0_i32_1 = arith.constant 0 : i32
    return %c0_i32, %c0_i32_0 : i32, i32
  }
  func.func @transform_8(%arg0: i32) -> (i32, i32) {
    %c0_i32 = arith.constant 0 : i32
    %c0_i32_0 = arith.constant 0 : i32
    %c0_i32_1 = arith.constant 0 : i32
    return %c0_i32, %c0_i32_0 : i32, i32
  }
  func.func @transform_9(%arg0: i32) -> (i32, i32) {
    %c0_i32 = arith.constant 0 : i32
    %c0_i32_0 = arith.constant 0 : i32
    %c0_i32_1 = arith.constant 0 : i32
    return %c0_i32, %c0_i32_0 : i32, i32
  }
  func.func @transform_10(%arg0: i32) -> (i32, i32) {
    %c0_i32 = arith.constant 0 : i32
    %c0_i32_0 = arith.constant 0 : i32
    %c0_i32_1 = arith.constant 0 : i32
    return %c0_i32, %c0_i32_0 : i32, i32
  }
  func.func @transform_11(%arg0: i32) -> (i32, i32) {
    %c0_i32 = arith.constant 0 : i32
    %c0_i32_0 = arith.constant 0 : i32
    %c0_i32_1 = arith.constant 0 : i32
    return %c0_i32, %c0_i32_0 : i32, i32
  }
  func.func @transform_12(%arg0: i32) -> (i32, i32) {
    %c0_i32 = arith.constant 0 : i32
    %c0_i32_0 = arith.constant 0 : i32
    %c0_i32_1 = arith.constant 0 : i32
    return %c0_i32, %c0_i32_0 : i32, i32
  }
  func.func @transform_13(%arg0: i32) -> (i32, i32) {
    %c0_i32 = arith.constant 0 : i32
    %c0_i32_0 = arith.constant 0 : i32
    %c0_i32_1 = arith.constant 0 : i32
    return %c0_i32, %c0_i32_0 : i32, i32
  }
  func.func @transform_14(%arg0: i32) -> (i32, i32) {
    %c0_i32 = arith.constant 0 : i32
    %c0_i32_0 = arith.constant 0 : i32
    %c0_i32_1 = arith.constant 0 : i32
    return %c0_i32, %c0_i32_0 : i32, i32
  }
}

</mosaic_0001>

<bundles_post_ra>
// kernel: ufgconv_forward.1
= control target key start
LH: loop header
LB: loop body
LE: loop exit
PB: predicated region body
PF: predicated region fallthrough
CT: control target
= control target key end

     0   :  { %vm89_vm0 = vcmask 130048   ;;  %vm219_vm1 = vcmask 523264   ;;  %vm540_vm2 = vcmask 261120   ;;  %vm3084_vm3 = vmmov 0   ;;  %s3899_s3 = inlined_call_operand.vmem [shape: f32[16,32], index: 3, kind: input, shape index: {}]   ;;  %s3900_s0 = inlined_call_operand.vmem [shape: f32[64,16], index: 0, kind: input, shape index: {}]   ;;  %s3901_s1 = inlined_call_operand.vmem [shape: f32[192,64], index: 1, kind: input, shape index: {}]   ;;  %s3902_s6 = inlined_call_operand.vmem [shape: f32[32,32], index: 6, kind: input, shape index: {}]   ;;  %s3903_s8 = inlined_call_operand.vmem [shape: f32[1,32], index: 8, kind: input, shape index: {}]   ;;  %s3904_s10 = inlined_call_operand.vmem [shape: f32[32,32], index: 10, kind: input, shape index: {}]   ;;  %s3905_s7 = inlined_call_operand.vmem [shape: f32[1,32], index: 7, kind: input, shape index: {}]   ;;  %s3906_s12 = inlined_call_operand.vmem [shape: f32[1,32], index: 12, kind: input, shape index: {}]   ;;  %s3907_s2 = inlined_call_operand.vmem [shape: f32[64,64], index: 2, kind: input, shape index: {}]   ;;  %s3908_s11 = inlined_call_operand.vmem [shape: f32[1,32], index: 11, kind: input, shape index: {}]   ;;  %s3909_s4 = inlined_call_operand.vmem [shape: f32[64,1], index: 4, kind: input, shape index: {}]   ;;  %s3910_s9 = inlined_call_operand.vmem [shape: f32[1,32], index: 9, kind: input, shape index: {}]   ;;  %s3911_s13 = inlined_call_operand.vmem [shape: f32[1,32], index: 13, kind: input, shape index: {}]   ;;  %s3912_s5 = inlined_call_operand.vmem [shape: f32[1,32], index: 5, kind: input, shape index: {}]   ;;  %s3913_s14 = inlined_call_operand.vmem [shape: f32[64,32], index: 14, kind: output, shape index: {}]  }
   0x1   :  { %v87_v0 = vld [vmem:[%s3899_s3] sm:$0xff]  ;;  %v88_v1 = vld [vmem:[%s3899_s3 + $0x8] sm:$0xff]  ;;  %v81_v5 = vld [vmem:[%s3900_s0 + $0x10] sm:$0xff] }
   0x2   :  { %v79_v2 = vld [vmem:[%s3900_s0] sm:$0xff]  ;;  %v2785_v3 = vpack.c.bf16 %v88_v1, %v87_v0  ;;  %v80_v4 = vld [vmem:[%s3900_s0 + $0x8] sm:$0xff]  ;;  %v82_v6 = vld [vmem:[%s3900_s0 + $0x18] sm:$0xff] }
   0x3   :  { %2503 = vmatprep.mubr.msk.f32.mxu0 %vm89_vm0, %v79_v2  ;;  %v83_v7 = vld [vmem:[%s3900_s0 + $0x20] sm:$0xff]  ;;  %v84_v8 = vld [vmem:[%s3900_s0 + $0x28] sm:$0xff]  ;;  %v85_v9 = vld [vmem:[%s3900_s0 + $0x30] sm:$0xff] }
   0x4   :  { %2786 = vmatprep.subr.bf16.mxu0 %v2785_v3  ;;  %v86_v10 = vld [vmem:[%s3900_s0 + $0x38] sm:$0xff]  ;;  %v47_v11 = vld [vmem:[%s3901_s1] sm:$0xff]  ;;  %v534_v23 = vld [vmem:[%s3902_s6 + $0x8] sm:$0xff] }
   0x5   :  { %2788 = vmatpush3.bf16.msra.mxu0 %v2785_v3  ;;  %v59_v12 = vld [vmem:[%s3901_s1 + $0x60] sm:$0xff]  ;;  %v48_v28 = vld [vmem:[%s3901_s1 + $0x8] sm:$0xff]  ;;  %v49_v30 = vld [vmem:[%s3901_s1 + $0x10] sm:$0xff] }
   0x6   :  { %2549 = vmatprep.mubr.msk.f32.mxu1 %vm219_vm1, %v59_v12  ;;  %v533_v22 = vld [vmem:[%s3902_s6] sm:$0xff]  ;;  %v60_v29 = vld [vmem:[%s3901_s1 + $0x68] sm:$0xff]  ;;  %v61_v31 = vld [vmem:[%s3901_s1 + $0x70] sm:$0xff] }
   0x7   :  { %v2805_v27 = vpack.c.bf16 %v534_v23, %v533_v22  ;;  %v50_v32 = vld [vmem:[%s3901_s1 + $0x18] sm:$0xff]  ;;  %v51_v34 = vld [vmem:[%s3901_s1 + $0x20] sm:$0xff]  ;;  %v52_v35 = vld [vmem:[%s3901_s1 + $0x28] sm:$0xff] }
   0x8   :  { %2504 = vmatmul.mubr.msk.f32.vlgmr.msra.gmra.mrb[0].mxu0 %vm89_vm0, %v80_v4  ;;  %v62_v33 = vld [vmem:[%s3901_s1 + $0x78] sm:$0xff]  ;;  %v53_v36 = vld [vmem:[%s3901_s1 + $0x30] sm:$0xff]  ;;  %v55_v38 = vld [vmem:[%s3901_s1 + $0x40] sm:$0xff] }
   0x9   :  { %2506 = vmatprep.mubr.msk.f32.mxu0 %vm89_vm0, %v81_v5  ;;  %v54_v37 = vld [vmem:[%s3901_s1 + $0x38] sm:$0xff]  ;;  %v56_v39 = vld [vmem:[%s3901_s1 + $0x48] sm:$0xff]  ;;  %v57_v40 = vld [vmem:[%s3901_s1 + $0x50] sm:$0xff]  ;;  %v3083_v5 = vmov 0.0|0.0  }
   0xa   :  { %v58_v41 = vld [vmem:[%s3901_s1 + $0x58] sm:$0xff]  ;;  %v535_v42 = vld [vmem:[%s3902_s6 + $0x10] sm:$0xff]  ;;  %v63_v45 = vld [vmem:[%s3901_s1 + $0x80] sm:$0xff] }
   0xb   :  { %v536_v43 = vld [vmem:[%s3902_s6 + $0x18] sm:$0xff]  ;;  %v64_v46 = vld [vmem:[%s3901_s1 + $0x88] sm:$0xff]  ;;  %v65_v47 = vld [vmem:[%s3901_s1 + $0x90] sm:$0xff] }
   0xc   :  { %2507 = vmatmul.mubr.msk.f32.gmra.mrb[2].mxu0 %vm89_vm0, %v82_v6  ;;  %v2809_v44 = vpack.c.bf16 %v536_v43, %v535_v42  ;;  %v66_v48 = vld [vmem:[%s3901_s1 + $0x98] sm:$0xff]  ;;  %v67_v49 = vld [vmem:[%s3901_s1 + $0xa0] sm:$0xff]  ;;  %v68_v50 = vld [vmem:[%s3901_s1 + $0xa8] sm:$0xff]  ;;  %v3085_v6 = vmov 0.0  }
   0xd   :  { %2509 = vmatprep.mubr.msk.f32.mxu0 %vm89_vm0, %v83_v7  ;;  %v69_v51 = vld [vmem:[%s3901_s1 + $0xb0] sm:$0xff]  ;;  %v70_v52 = vld [vmem:[%s3901_s1 + $0xb8] sm:$0xff]  ;;  %vm3356_vm4 = vmpackc.low %vm540_vm2, %vm540_vm2 }
  0x10   :  { %2510 = vmatmul.mubr.msk.f32.gmra.mrb[4].mxu0 %vm89_vm0, %v84_v8 }
  0x11   :  { %2512 = vmatprep.mubr.msk.f32.mxu0 %vm89_vm0, %v85_v9 }
  0x14   :  { %2513 = vmatmul.mubr.msk.f32.gmra.mrb[6].mxu0 %vm89_vm0, %v86_v10 }
  0x15   :  { %2531 = vmatprep.mubr.msk.f32.mxu0 %vm219_vm1, %v47_v11 }
  0xdb   :  { %v2505_v13 = vpop.f32.mrb[0].mxu0 }
  0xdc   :  { %v180_v14 = vpop.f32.mrb[1].mxu0 }
  0xdd   :  { %v2789_v15 = vpack.c.bf16 %v2505_v13, %v180_v14 }
  0xdf   :  { %v2508_v16 = vpop.f32.mrb[2].mxu0  ;;  %2790 = vmatprep.subr.bf16.mxu0 %v2789_v15  ;;  %2933 = vmatprep.subr.bf16.mxu1 %v2789_v15 }
  0xe0   :  { %v190_v17 = vpop.f32.mrb[3].mxu0  ;;  %2792 = vmatpush3.bf16.msra.mxu0 %v2789_v15  ;;  %2937 = vmatpush3.bf16.msra.mxu1 %v2789_v15  ;;  %v2248_v15 = vld [vmem:[%s3903_s8] ss:$0 sm:$0xff] }
  0xe1   :  { %v2793_v18 = vpack.c.bf16 %v2508_v16, %v190_v17 }
  0xe3   :  { %v2511_v19 = vpop.f32.mrb[4].mxu0  ;;  %2794 = vmatprep.subr.bf16.mxu0 %v2793_v18  ;;  %2934 = vmatprep.subr.bf16.mxu1 %v2793_v18 }
  0xe4   :  { %v200_v20 = vpop.f32.mrb[5].mxu0  ;;  %2796 = vmatpush3.bf16.msra.mxu0 %v2793_v18  ;;  %2938 = vmatpush3.bf16.msra.mxu1 %v2793_v18 }
  0xe5   :  { %v2797_v21 = vpack.c.bf16 %v2511_v19, %v200_v20 }
  0xe7   :  { %v2514_v24 = vpop.f32.mrb[6].mxu0  ;;  %2798 = vmatprep.subr.bf16.mxu0 %v2797_v21  ;;  %2935 = vmatprep.subr.bf16.mxu1 %v2797_v21 }
  0xe8   :  { %v210_v25 = vpop.f32.mrb[7].mxu0  ;;  %2800 = vmatpush3.bf16.msra.mxu0 %v2797_v21  ;;  %2939 = vmatpush3.bf16.msra.mxu1 %v2797_v21 }
  0xe9   :  { %v2801_v26 = vpack.c.bf16 %v2514_v24, %v210_v25 }
  0xeb   :  { %2802 = vmatprep.subr.bf16.mxu0 %v2801_v26  ;;  %2936 = vmatprep.subr.bf16.mxu1 %v2801_v26 }
  0xec   :  { %2804 = vmatpush3.bf16.msra.mxu0 %v2801_v26  ;;  %2940 = vmatpush3.bf16.msra.mxu1 %v2801_v26 }
  0xed   :  { %2806 = vmatprep.subr.bf16.mxu0 %v2805_v27 }
  0xef   :  { %2532 = vmatmul.mubr.msk.f32.vlgmr.msra.gmra.mrb[8].mxu0 %vm219_vm1, %v48_v28  ;;  %2550 = vmatmul.mubr.msk.f32.vlgmr.msra.gmra.mrb[0].mxu1 %vm219_vm1, %v60_v29 }
  0xf0   :  { %2534 = vmatprep.mubr.msk.f32.mxu0 %vm219_vm1, %v49_v30  ;;  %2552 = vmatprep.mubr.msk.f32.mxu1 %vm219_vm1, %v61_v31 }
  0xf1   :  { %2808 = vmatpush3.bf16.msra.mxu0 %v2805_v27 }
  0xf2   :  { %2810 = vmatprep.subr.bf16.mxu0 %v2809_v44 }
  0xf3   :  { %2535 = vmatmul.mubr.msk.f32.gmra.mrb[10].mxu0 %vm219_vm1, %v50_v32  ;;  %2553 = vmatmul.mubr.msk.f32.gmra.mrb[2].mxu1 %vm219_vm1, %v62_v33 }
  0xf4   :  { %2537 = vmatprep.mubr.msk.f32.mxu0 %vm219_vm1, %v51_v34  ;;  %2555 = vmatprep.mubr.msk.f32.mxu1 %vm219_vm1, %v63_v45  ;;  %v1112_v45 = vld [vmem:[%s3904_s10] sm:$0xff] }
  0xf5   :  { %2812 = vmatpush3.bf16.msra.mxu0 %v2809_v44 }
  0xf6   :  { %2813 = vmatprep.subr.bf16.mxu0 %v3083_v5 }
  0xf7   :  { %2538 = vmatmul.mubr.msk.f32.gmra.mrb[12].mxu0 %vm219_vm1, %v52_v35  ;;  %2556 = vmatmul.mubr.msk.f32.gmra.mrb[4].mxu1 %vm219_vm1, %v64_v46  ;;  %v1113_v46 = vld [vmem:[%s3904_s10 + $0x8] sm:$0xff] }
  0xf8   :  { %2540 = vmatprep.mubr.msk.f32.mxu0 %vm219_vm1, %v53_v36  ;;  %2558 = vmatprep.mubr.msk.f32.mxu1 %vm219_vm1, %v65_v47  ;;  %v2845_v47 = vpack.c.bf16 %v1113_v46, %v1112_v45  ;;  %v3459_v46 = vld [vmem:[%s3907_s2] sm:$0xff] }
  0xfb   :  { %2541 = vmatmul.mubr.msk.f32.gmra.mrb[14].mxu0 %vm219_vm1, %v54_v37  ;;  %2559 = vmatmul.mubr.msk.f32.gmra.mrb[6].mxu1 %vm219_vm1, %v66_v48  ;;  %v1114_v48 = vld [vmem:[%s3904_s10 + $0x10] sm:$0xff] }
  0xfc   :  { %2543 = vmatprep.mubr.msk.f32.mxu0 %vm219_vm1, %v55_v38  ;;  %2561 = vmatprep.mubr.msk.f32.mxu1 %vm219_vm1, %v67_v49  ;;  %v1115_v49 = vld [vmem:[%s3904_s10 + $0x18] sm:$0xff] }
  0xff   :  { %2544 = vmatmul.mubr.msk.f32.gmra.mrb[16].mxu0 %vm219_vm1, %v56_v39  ;;  %2562 = vmatmul.mubr.msk.f32.gmra.mrb[8].mxu1 %vm219_vm1, %v68_v50  ;;  %v537_v50 = vld [vmem:[%s3905_s7] sm:$0x1] }
 0x100   :  { %2546 = vmatprep.mubr.msk.f32.mxu0 %vm219_vm1, %v57_v40  ;;  %2564 = vmatprep.mubr.msk.f32.mxu1 %vm219_vm1, %v69_v51  ;;  %v2849_v51 = vpack.c.bf16 %v1115_v49, %v1114_v48 }
 0x103   :  { %2547 = vmatmul.mubr.msk.f32.gmra.mrb[18].mxu0 %vm219_vm1, %v58_v41  ;;  %2565 = vmatmul.mubr.msk.f32.gmra.mrb[10].mxu1 %vm219_vm1, %v70_v52  ;;  %v805_v52 = vlaneseq }
 0x1c2   :  { %v3308_v53 = vpop.f32.mrb[8].mxu0  ;;  %v2551_v54 = vpop.f32.mrb[0].mxu1 }
 0x1c3   :  { %v3310_v55 = vpop.f32.mrb[9].mxu0  ;;  %v418_v56 = vpop.f32.mrb[1].mxu1 }
 0x1c6   :  { %v3312_v57 = vpop.f32.mrb[10].mxu0  ;;  %v2554_v58 = vpop.f32.mrb[2].mxu1 }
 0x1c7   :  { %v3314_v59 = vpop.f32.mrb[11].mxu0  ;;  %v428_v60 = vpop.f32.mrb[3].mxu1 }
 0x1ca   :  { %v3316_v61 = vpop.f32.mrb[12].mxu0  ;;  %v3335_v7 = vpop.f32.mrb[4].mxu1 }
 0x1cb   :  { %v3318_v62 = vpop.f32.mrb[13].mxu0  ;;  %v3337_v8 = vpop.f32.mrb[5].mxu1 }
 0x1ce   :  { %v3320_v63 = vpop.f32.mrb[14].mxu0  ;;  %v3339_v9 = vpop.f32.mrb[6].mxu1 }
 0x1cf   :  { %v3322_v0 = vpop.f32.mrb[15].mxu0  ;;  %v3341_v10 = vpop.f32.mrb[7].mxu1 }
 0x1d2   :  { %v2545_v1 = vpop.f32.mrb[16].mxu0  ;;  %v3343_v11 = vpop.f32.mrb[8].mxu1 }
 0x1d3   :  { %v398_v2 = vpop.f32.mrb[17].mxu0  ;;  %v3345_v12 = vpop.f32.mrb[9].mxu1 }
 0x1d4   :  { %2575 = vmatprep.mubr.msk.f32.mxu0 %vm540_vm2, %v398_v2 }
 0x1d5   :  { %2576 = vmatmul.mubr.msk.f32.vlgmr.msra.gmra.mrb[20].mxu0 %vm540_vm2, %v2545_v1 }
 0x1d6   :  { %v2548_v3 = vpop.f32.mrb[18].mxu0  ;;  %v3347_v13 = vpop.f32.mrb[10].mxu1 }
 0x1d7   :  { %v408_v4 = vpop.f32.mrb[19].mxu0  ;;  %v3349_v14 = vpop.f32.mrb[11].mxu1 }
 0x1d8   :  { %2578 = vmatprep.mubr.msk.f32.mxu0 %vm540_vm2, %v408_v4 }
 0x1d9   :  { %2579 = vmatmul.mubr.msk.f32.gmra.mrb[22].mxu0 %vm540_vm2, %v2548_v3  ;;  %v2283_v3 = vld [vmem:[%s3906_s12] ss:$0 sm:$0xff] }
 0x1da   :  { %2581 = vmatprep.mubr.msk.f32.mxu0 %vm540_vm2, %v418_v56  ;;  %v3414_v56 = vshrl.u32 %v805_v52, 7 }
 0x1dd   :  { %2582 = vmatmul.mubr.msk.f32.gmra.mrb[24].mxu0 %vm540_vm2, %v2551_v54 }
 0x1de   :  { %2584 = vmatprep.mubr.msk.f32.mxu0 %vm540_vm2, %v428_v60  ;;  %v807_v60 = vsub.s32 0, %v3414_v56 }
 0x1e1   :  { %2585 = vmatmul.mubr.msk.f32.gmra.mrb[26].mxu0 %vm540_vm2, %v2554_v58 }
 0x1e2   :  { %2603 = vmatprep.mubr.msk.f32.mxu0 %vm3084_vm3, %v3085_v6 }
 0x2a8   :  { %v2577_v16 = vpop.f32.mrb[20].mxu0 }
 0x2a9   :  { %v631_v17 = vpop.f32.mrb[21].mxu0  ;;  %v677_v21 = vmul.f32 %v2577_v16, %v2248_v15 }
 0x2aa   :  { %v2814_v19 = vpack.c.bf16 %v2577_v16, %v631_v17  ;;  %v676_v20 = vmul.f32 %v2248_v15, %v631_v17 }
 0x2ab   :  { %v687_v27 = vsel %vm540_vm2, %v677_v21, 0.0 }
 0x2ac   :  { %v2580_v22 = vpop.f32.mrb[22].mxu0  ;;  %2816 = vmatpush3.bf16.xpose.msk.msra.mxu0 %vm3356_vm4, %v2814_v19  ;;  %2830 = vmatprep.subr.bf16.mxu1 %v2814_v19  ;;  %v684_v23 = vsel %vm540_vm2, %v676_v20, 0.0 }
 0x2ad   :  { %2832 = vmatpush3.bf16.msra.mxu1 %v2814_v19  ;;  %685 = vadd.xlane.f32.xlu0 %v684_v23  ;;  %v641_v24 = vpop.f32.mrb[23].mxu0  ;;  %v679_v30 = vmul.f32 %v2580_v22, %v2248_v15 }
 0x2ae   :  { %v2818_v25 = vpack.c.bf16 %v2580_v22, %v641_v24  ;;  %v678_v26 = vmul.f32 %v2248_v15, %v641_v24  ;;  %2817 = vmatprep.subr.bf16.mxu0 %v3083_v5 }
 0x2af   :  { %v693_v37 = vsel %vm540_vm2, %v679_v30, 0.0 }
 0x2b0   :  { %2834 = vmatprep.subr.bf16.mxu1 %v2818_v25  ;;  %v690_v28 = vsel %vm540_vm2, %v678_v26, 0.0  ;;  %v2583_v29 = vpop.f32.mrb[24].mxu0 }
 0x2b1   :  { %688 = vadd.xlane.f32.xlu0 %v687_v27  ;;  %2836 = vmatpush3.bf16.msra.mxu1 %v2818_v25  ;;  %v651_v31 = vpop.f32.mrb[25].mxu0  ;;  %v681_v34 = vmul.f32 %v2583_v29, %v2248_v15 }
 0x2b2   :  { %691 = vadd.xlane.f32.xlu1 %v690_v28  ;;  %v680_v32 = vmul.f32 %v2248_v15, %v651_v31  ;;  %v2822_v33 = vpack.c.bf16 %v2583_v29, %v651_v31 }
 0x2b3   :  { %v699_v41 = vsel %vm540_vm2, %v681_v34, 0.0 }
 0x2b4   :  { %2820 = vmatpush3.bf16.xpose.msk.msra.mxu0 %vm3356_vm4, %v2818_v25  ;;  %2838 = vmatprep.subr.bf16.mxu1 %v2822_v33  ;;  %v696_v35 = vsel %vm540_vm2, %v680_v32, 0.0  ;;  %v2586_v36 = vpop.f32.mrb[26].mxu0 }
 0x2b5   :  { %2840 = vmatpush3.bf16.msra.mxu1 %v2822_v33  ;;  %697 = vadd.xlane.f32.xlu0 %v696_v35  ;;  %v661_v38 = vpop.f32.mrb[27].mxu0  ;;  %v683_v42 = vmul.f32 %v2586_v36, %v2248_v15 }
 0x2b6   :  { %694 = vadd.xlane.f32.xlu1 %v693_v37  ;;  %2821 = vmatprep.subr.bf16.mxu0 %v3083_v5  ;;  %v682_v39 = vmul.f32 %v2248_v15, %v661_v38  ;;  %v2826_v40 = vpack.c.bf16 %v2586_v36, %v661_v38 }
 0x2b7   :  { %v705_v44 = vsel %vm540_vm2, %v683_v42, 0.0 }
 0x2b8   :  { %2842 = vmatprep.subr.bf16.mxu1 %v2826_v40  ;;  %v702_v43 = vsel %vm540_vm2, %v682_v39, 0.0 }
 0x2b9   :  { %2844 = vmatpush3.bf16.msra.mxu1 %v2826_v40  ;;  %703 = vadd.xlane.f32.xlu0 %v702_v43 }
 0x2ba   :  { %700 = vadd.xlane.f32.xlu1 %v699_v41 }
 0x2bc   :  { %2824 = vmatpush3.bf16.xpose.msk.msra.mxu0 %vm3356_vm4, %v2822_v33 }
 0x2bd   :  { %2825 = vmatprep.subr.bf16.mxu0 %v3083_v5 }
 0x2be   :  { %706 = vadd.xlane.f32.xlu1 %v705_v44 }
 0x2c4   :  { %2828 = vmatpush3.bf16.xpose.msk.msra.mxu0 %vm3356_vm4, %v2826_v40  ;;  %v3452_v40 = vld [vmem:[%s3907_s2 + $0x8] sm:$0xff] }
 0x2c5   :  { %2846 = vmatprep.subr.bf16.mxu0 %v2845_v47 }
 0x2cb   :  { %2604 = vmatmul.mubr.msk.f32.vlgmr.msra.gmra.mrb[28].mxu0 %vm540_vm2, %v537_v50 }
 0x2cc   :  { %2848 = vmatpush3.bf16.msra.mxu0 %v2845_v47  ;;  %2642 = vmatprep.mubr.msk.f32.mxu0 %vm540_vm2, %v3337_v8 }
 0x2cd   :  { %2850 = vmatprep.subr.bf16.mxu0 %v2849_v51 }
 0x2d0   :  { %2852 = vmatpush3.bf16.msra.mxu0 %v2849_v51 }
 0x2d1   :  { %2853 = vmatprep.subr.bf16.mxu0 %v3083_v5 }
 0x2d3   :  { %2643 = vmatmul.mubr.msk.f32.vlgmr.msra.gmra.mrb[30].mxu0 %vm540_vm2, %v3335_v7 }
 0x2d4   :  { %2645 = vmatprep.mubr.msk.f32.mxu0 %vm540_vm2, %v3341_v10 }
 0x2d7   :  { %2646 = vmatmul.mubr.msk.f32.gmra.mrb[32].mxu0 %vm540_vm2, %v3339_v9 }
 0x2d8   :  { %2648 = vmatprep.mubr.msk.f32.mxu0 %vm540_vm2, %v3345_v12 }
 0x2db   :  { %2649 = vmatmul.mubr.msk.f32.gmra.mrb[34].mxu0 %vm540_vm2, %v3343_v11 }
 0x2dc   :  { %2651 = vmatprep.mubr.msk.f32.mxu0 %vm540_vm2, %v3349_v14 }
 0x2df   :  { %2652 = vmatmul.mubr.msk.f32.gmra.mrb[36].mxu0 %vm540_vm2, %v3347_v13 }
 0x2e0   :  { %2670 = vmatprep.mubr.msk.f32.mxu0 %vm3084_vm3, %v3085_v6 }
 0x33a   :  { %v686_v1 = vpop.xlane.xlu0 %685 }
 0x33e   :  { %v689_v11 = vpop.xlane.xlu0 %688 }
 0x33f   :  { %v692_v2 = vpop.xlane.xlu1 %691 }
 0x342   :  { %v698_v35 = vpop.xlane.xlu0 %697 }
 0x343   :  { %v695_v13 = vpop.xlane.xlu1 %694 }
 0x347   :  { %v701_v32 = vpop.xlane.xlu1 %700 }
 0x34b   :  { %v707_v49 = vpop.xlane.xlu1 %706 }
 0x39e   :  { %v801_v54 = vpop.f32.mrb[28].mxu0 }
 0x39f   :  { %v2605_v58 = vpop.f32.mrb[29].mxu0  ;;  %v3422_v4 = vrot.slane %v801_v54, %v807_v60 }
 0x3a1   :  { %v810_v16 = vadd.f32 %v3422_v4, %v689_v11  ;;  %v809_v20 = vadd.f32 %v3422_v4, %v686_v1  ;;  %v812_v27 = vadd.f32 %v3422_v4, %v695_v13  ;;  %v811_v31 = vadd.f32 %v3422_v4, %v692_v2  ;;  %v704_v1 = vpop.xlane.xlu0 %703 }
 0x3a2   :  { %v814_v37 = vadd.f32 %v3422_v4, %v701_v32  ;;  %v813_v43 = vadd.f32 %v3422_v4, %v698_v35  ;;  %v816_v58 = vadd.f32 %v3422_v4, %v707_v49  ;;  %v815_v13 = vadd.f32 %v3422_v4, %v704_v1  ;;  %v3500_v4 = vld [vmem:[%s3907_s2 + $0x28] sm:$0xff] }
 0x3a3   :  { %v826_v26 = vmul.f32 0.2, %v810_v16  ;;  %vm818_vm5 = vcmp.gt.f32.partialorder %v810_v16, 0.0  ;;  %v825_v30 = vmul.f32 0.2, %v809_v20  ;;  %vm817_vm6 = vcmp.gt.f32.partialorder %v809_v20, 0.0 }
 0x3a4   :  { %v828_v42 = vmul.f32 0.2, %v812_v27  ;;  %vm820_vm7 = vcmp.gt.f32.partialorder %v812_v27, 0.0  ;;  %v827_v48 = vmul.f32 0.2, %v811_v31  ;;  %vm819_vm8 = vcmp.gt.f32.partialorder %v811_v31, 0.0 }
 0x3a5   :  { %v834_v41 = vsel %vm818_vm5, %v810_v16, %v826_v26  ;;  %v833_v47 = vsel %vm817_vm6, %v809_v20, %v825_v30  ;;  %vm822_vm9 = vcmp.gt.f32.partialorder %v814_v37, 0.0  ;;  %vm821_vm10 = vcmp.gt.f32.partialorder %v813_v43, 0.0  ;;  %v3526_v30 = vld [vmem:[%s3907_s2 + $0x30] sm:$0xff] }
 0x3a6   :  { %v2644_v7 = vpop.f32.mrb[30].mxu0  ;;  %v3466_v54 = vadd.f32 %v834_v41, %v3452_v40  ;;  %v835_v11 = vsel %vm819_vm8, %v811_v31, %v827_v48  ;;  %v832_v20 = vmul.f32 0.2, %v816_v58  ;;  %vm824_vm11 = vcmp.gt.f32.partialorder %v816_v58, 0.0 }
 0x3a7   :  { %v1255_v8 = vmul.f32 %v2644_v7, %v2283_v3  ;;  %v1209_v6 = vpop.f32.mrb[31].mxu0  ;;  %vm823_vm12 = vcmp.gt.f32.partialorder %v815_v13, 0.0 }
 0x3a8   :  { %v1254_v9 = vmul.f32 %v2283_v3, %v1209_v6  ;;  %v3424_v10 = vpack.c.bf16 %v2644_v7, %v1209_v6  ;;  %v3471_v7 = vadd.f32 %v833_v47, %v3459_v46  ;;  %v830_v6 = vmul.f32 0.2, %v814_v37 }
 0x3a9   :  { %v1265_v12 = vsel %vm540_vm2, %v1255_v8, 0.0  ;;  %v836_v8 = vsel %vm820_vm7, %v812_v27, %v828_v42 }
 0x3aa   :  { %1266 = vadd.xlane.f32.xlu1 %v1265_v12  ;;  %v2647_v14 = vpop.f32.mrb[32].mxu0  ;;  %2856 = vmatpush3.bf16.xpose.msk.msra.mxu0 %vm3356_vm4, %v3424_v10  ;;  %v1262_v15 = vsel %vm540_vm2, %v1254_v9, 0.0  ;;  %v3481_v9 = vld [vmem:[%s3907_s2 + $0x10] sm:$0xff]  ;;  %v829_v12 = vmul.f32 0.2, %v813_v43  ;;  %v849_v16 = vsel %vm219_vm1, %v3471_v7, -inf }
 0x3ab   :  { %v1257_v17 = vmul.f32 %v2647_v14, %v2283_v3  ;;  %2870 = vmatprep.subr.bf16.mxu1 %v3424_v10  ;;  %v1219_v19 = vpop.f32.mrb[33].mxu0  ;;  %1263 = vadd.xlane.f32.xlu0 %v1262_v15 }
 0x3ac   :  { %v1256_v21 = vmul.f32 %v2283_v3, %v1219_v19  ;;  %v3434_v22 = vpack.c.bf16 %v2647_v14, %v1219_v19  ;;  %2857 = vmatprep.subr.bf16.mxu0 %v3083_v5  ;;  %v852_v14 = vsel %vm219_vm1, %v3466_v54, -inf  ;;  %v838_v19 = vsel %vm822_vm9, %v814_v37, %v830_v6 }
 0x3ad   :  { %v1271_v23 = vsel %vm540_vm2, %v1257_v17, 0.0  ;;  %v3495_v17 = vadd.f32 %v835_v11, %v3481_v9  ;;  %v3511_v26 = vadd.f32 %v838_v19, %v3500_v4 }
 0x3ae   :  { %1272 = vadd.xlane.f32.xlu1 %v1271_v23  ;;  %v2650_v24 = vpop.f32.mrb[34].mxu0  ;;  %v1268_v25 = vsel %vm540_vm2, %v1256_v21, 0.0  ;;  %v3506_v21 = vld [vmem:[%s3907_s2 + $0x20] sm:$0xff]  ;;  %v837_v23 = vsel %vm821_vm10, %v813_v43, %v829_v12 }
 0x3af   :  { %v1259_v28 = vmul.f32 %v2650_v24, %v2283_v3  ;;  %v1229_v29 = vpop.f32.mrb[35].mxu0  ;;  %1269 = vadd.xlane.f32.xlu0 %v1268_v25  ;;  %v855_v27 = vsel %vm219_vm1, %v3495_v17, -inf  ;;  %v864_v32 = vsel %vm219_vm1, %v3511_v26, -inf }
 0x3b0   :  { %v1258_v33 = vmul.f32 %v2283_v3, %v1229_v29  ;;  %v3441_v34 = vpack.c.bf16 %v2650_v24, %v1229_v29  ;;  %v831_v24 = vmul.f32 0.2, %v815_v13  ;;  %v840_v29 = vsel %vm824_vm11, %v816_v58, %v832_v20 }
 0x3b1   :  { %v1277_v36 = vsel %vm540_vm2, %v1259_v28, 0.0  ;;  %v3521_v28 = vld [vmem:[%s3907_s2 + $0x38] sm:$0xff] }
 0x3b2   :  { %2860 = vmatpush3.bf16.xpose.msk.msra.mxu0 %vm3356_vm4, %v3434_v22  ;;  %1278 = vadd.xlane.f32.xlu1 %v1277_v36  ;;  %v2653_v38 = vpop.f32.mrb[36].mxu0  ;;  %v1274_v39 = vsel %vm540_vm2, %v1258_v33, 0.0  ;;  %v839_v31 = vsel %vm823_vm12, %v815_v13, %v831_v24  ;;  %v3531_v33 = vadd.f32 %v840_v29, %v3521_v28 }
 0x3b3   :  { %v1261_v44 = vmul.f32 %v2653_v38, %v2283_v3  ;;  %v1239_v45 = vpop.f32.mrb[37].mxu0  ;;  %1275 = vadd.xlane.f32.xlu0 %v1274_v39  ;;  %2861 = vmatprep.subr.bf16.mxu0 %v3083_v5  ;;  %v3539_v36 = vadd.f32 %v839_v31, %v3526_v30  ;;  %v1116_v39 = vld [vmem:[%s3908_s11] sm:$0x1] }
 0x3b4   :  { %v1260_v50 = vmul.f32 %v2283_v3, %v1239_v45  ;;  %v3462_v51 = vpack.c.bf16 %v2653_v38, %v1239_v45  ;;  %v3476_v3 = vld [vmem:[%s3907_s2 + $0x18] sm:$0xff]  ;;  %v870_v37 = vsel %vm219_vm1, %v3531_v33, -inf }
 0x3b5   :  { %v1283_v52 = vsel %vm540_vm2, %v1261_v44, 0.0  ;;  %v3487_v15 = vadd.f32 %v836_v8, %v3476_v3  ;;  %v867_v38 = vsel %vm219_vm1, %v3539_v36, -inf }
 0x3b6   :  { %1284 = vadd.xlane.f32.xlu1 %v1283_v52  ;;  %v1280_v2 = vsel %vm540_vm2, %v1260_v50, 0.0 }
 0x3b7   :  { %1281 = vadd.xlane.f32.xlu0 %v1280_v2  ;;  %v858_v25 = vsel %vm219_vm1, %v3487_v15, -inf }
 0x3ba   :  { %2864 = vmatpush3.bf16.xpose.msk.msra.mxu0 %vm3356_vm4, %v3441_v34  ;;  %853 = vmax.xlane.f32.xlu1 %v852_v14 }
 0x3bb   :  { %850 = vmax.xlane.f32.xlu0 %v849_v16  ;;  %2865 = vmatprep.subr.bf16.mxu0 %v3083_v5  ;;  %v3516_v5 = vadd.f32 %v837_v23, %v3506_v21 }
 0x3bd   :  { %v861_v35 = vsel %vm219_vm1, %v3516_v5, -inf }
 0x3be   :  { %859 = vmax.xlane.f32.xlu1 %v858_v25 }
 0x3bf   :  { %856 = vmax.xlane.f32.xlu0 %v855_v27 }
 0x3c2   :  { %865 = vmax.xlane.f32.xlu1 %v864_v32  ;;  %2868 = vmatpush3.bf16.xpose.msk.msra.mxu0 %vm3356_vm4, %v3462_v51 }
 0x3c3   :  { %862 = vmax.xlane.f32.xlu0 %v861_v35 }
 0x3c6   :  { %871 = vmax.xlane.f32.xlu1 %v870_v37 }
 0x3c7   :  { %868 = vmax.xlane.f32.xlu0 %v867_v38 }
 0x3c9   :  { %2671 = vmatmul.mubr.msk.f32.vlgmr.msra.gmra.mrb[38].mxu0 %vm540_vm2, %v1116_v39 }
 0x437   :  { %v1267_v18 = vpop.xlane.xlu1 %1266 }
 0x438   :  { %v1264_v41 = vpop.xlane.xlu0 %1263 }
 0x43b   :  { %v1273_v42 = vpop.xlane.xlu1 %1272 }
 0x43c   :  { %v1270_v43 = vpop.xlane.xlu0 %1269 }
 0x43f   :  { %v1279_v44 = vpop.xlane.xlu1 %1278 }
 0x440   :  { %v1276_v45 = vpop.xlane.xlu0 %1275 }
 0x443   :  { %v1285_v47 = vpop.xlane.xlu1 %1284 }
 0x444   :  { %v1282_v48 = vpop.xlane.xlu0 %1281 }
 0x447   :  { %v854_v49 = vpop.xlane.xlu1 %853 }
 0x448   :  { %v851_v50 = vpop.xlane.xlu0 %850  ;;  %v874_v52 = vsub.f32 %v3466_v54, %v854_v49 }
 0x449   :  { %v873_v58 = vsub.f32 %v3471_v7, %v851_v50 }
 0x44a   :  { %v883_v11 = vmul.f32 1.442695, %v874_v52 }
 0x44b   :  { %v860_v1 = vpop.xlane.xlu1 %859  ;;  %v881_v12 = vmul.f32 1.442695, %v873_v58 }
 0x44c   :  { %v876_v13 = vsub.f32 %v3487_v15, %v860_v1  ;;  %v857_v14 = vpop.xlane.xlu0 %856  ;;  %2963 = vpow2.f32 %v883_v11 }
 0x44d   :  { %2965 = vpow2.f32 %v881_v12 }
 0x44f   :  { %v866_v31 = vpop.xlane.xlu1 %865 }
 0x450   :  { %v863_v37 = vpop.xlane.xlu0 %862 }
 0x451   :  { %v877_v58 = vsub.f32 %v3516_v5, %v863_v37 }
 0x453   :  { %v872_v1 = vpop.xlane.xlu1 %871 }
 0x49c   :  { %v1379_v2 = vpop.f32.mrb[38].mxu0 }
 0x49d   :  { %v1386_v8 = vrot.slane %v1379_v2, %v807_v60  ;;  %v2672_v6 = vpop.f32.mrb[39].mxu0 }
 0x49f   :  { %v1388_v16 = vadd.f32 %v1386_v8, %v1267_v18  ;;  %v1387_v19 = vadd.f32 %v1386_v8, %v1264_v41  ;;  %v1390_v20 = vadd.f32 %v1386_v8, %v1273_v42  ;;  %v1389_v23 = vadd.f32 %v1386_v8, %v1270_v43 }
 0x4a0   :  { %v1392_v24 = vadd.f32 %v1386_v8, %v1279_v44  ;;  %v1391_v25 = vadd.f32 %v1386_v8, %v1276_v45  ;;  %v1394_v54 = vadd.f32 %v1386_v8, %v1285_v47  ;;  %v1393_v27 = vadd.f32 %v1386_v8, %v1282_v48 }
 0x4a1   :  { %vm1396_vm13 = vcmp.gt.f32.partialorder %v1388_v16, 0.0  ;;  %v1404_v7 = vmul.f32 0.2, %v1388_v16  ;;  %vm1395_vm14 = vcmp.gt.f32.partialorder %v1387_v19, 0.0  ;;  %v1403_v29 = vmul.f32 0.2, %v1387_v19 }
 0x4a2   :  { %vm1398_vm15 = vcmp.gt.f32.partialorder %v1390_v20, 0.0  ;;  %v1406_v56 = vmul.f32 0.2, %v1390_v20  ;;  %vm1397_vm0 = vcmp.gt.f32.partialorder %v1389_v23, 0.0  ;;  %v1405_v60 = vmul.f32 0.2, %v1389_v23 }
 0x4a3   :  { %v1412_v32 = vsel %vm1396_vm13, %v1388_v16, %v1404_v7  ;;  %v1411_v15 = vsel %vm1395_vm14, %v1387_v19, %v1403_v29  ;;  %vm1400_vm3 = vcmp.gt.f32.partialorder %v1392_v24, 0.0  ;;  %v1408_v35 = vmul.f32 0.2, %v1392_v24 }
 0x4a4   :  { %v3555_v38 = vadd.f32 %v1412_v32, %v3452_v40  ;;  %v3558_v39 = vadd.f32 %v1411_v15, %v3459_v46  ;;  %v1414_v18 = vsel %vm1398_vm15, %v1390_v20, %v1406_v56  ;;  %v1413_v41 = vsel %vm1397_vm0, %v1389_v23, %v1405_v60  ;;  %v3596_v23 = vpop.eup %2963 }
 0x4a5   :  { %v875_v42 = vsub.f32 %v3495_v17, %v857_v14  ;;  %v3562_v43 = vadd.f32 %v1414_v18, %v3476_v3  ;;  %vm1399_vm4 = vcmp.gt.f32.partialorder %v1391_v25, 0.0  ;;  %v3569_v40 = vadd.f32 %v1413_v41, %v3481_v9  ;;  %v869_v9 = vpop.xlane.xlu0 %868 }
 0x4a6   :  { %v1430_v44 = vsel %vm219_vm1, %v3555_v38, -inf  ;;  %v1427_v45 = vsel %vm219_vm1, %v3558_v39, -inf  ;;  %v1407_v46 = vmul.f32 0.2, %v1391_v25  ;;  %v887_v47 = vmul.f32 1.442695, %v876_v13 }
 0x4a7   :  { %v878_v48 = vsub.f32 %v3511_v26, %v866_v31  ;;  %1431 = vmax.xlane.f32.xlu1 %v1430_v44  ;;  %1428 = vmax.xlane.f32.xlu0 %v1427_v45  ;;  %v1416_v17 = vsel %vm1400_vm3, %v1392_v24, %v1408_v35  ;;  %v1410_v3 = vmul.f32 0.2, %v1394_v54  ;;  %vm1402_vm5 = vcmp.gt.f32.partialorder %v1394_v54, 0.0 }
 0x4a8   :  { %v1415_v49 = vsel %vm1399_vm4, %v1391_v25, %v1407_v46  ;;  %vm1401_vm6 = vcmp.gt.f32.partialorder %v1393_v27, 0.0  ;;  %v1409_v50 = vmul.f32 0.2, %v1393_v27  ;;  %v885_v52 = vmul.f32 1.442695, %v875_v42 }
 0x4a9   :  { %v1436_v2 = vsel %vm219_vm1, %v3562_v43, -inf  ;;  %v1433_v26 = vsel %vm219_vm1, %v3569_v40, -inf  ;;  %v3579_v8 = vadd.f32 %v1416_v17, %v3500_v4  ;;  %v3582_v6 = vadd.f32 %v1415_v49, %v3506_v21 }
 0x4aa   :  { %v1418_v11 = vsel %vm1402_vm5, %v1394_v54, %v1410_v3  ;;  %v1417_v12 = vsel %vm1401_vm6, %v1393_v27, %v1409_v50  ;;  %2967 = vpow2.f32 %v887_v47  ;;  %v891_v5 = vmul.f32 1.442695, %v878_v48  ;;  %v3602_v54 = vpop.eup %2965 }
 0x4ab   :  { %1437 = vmax.xlane.f32.xlu1 %v1436_v2  ;;  %1434 = vmax.xlane.f32.xlu0 %v1433_v26  ;;  %v880_v13 = vsub.f32 %v3531_v33, %v872_v1  ;;  %2969 = vpow2.f32 %v885_v52  ;;  %v889_v14 = vmul.f32 1.442695, %v877_v58  ;;  %v879_v16 = vsub.f32 %v3539_v36, %v869_v9 }
 0x4ac   :  { %v1442_v19 = vsel %vm219_vm1, %v3579_v8, -inf  ;;  %v1439_v4 = vsel %vm219_vm1, %v3582_v6, -inf  ;;  %v3591_v21 = vadd.f32 %v1418_v11, %v3521_v28  ;;  %v3594_v20 = vadd.f32 %v1417_v12, %v3526_v30 }
 0x4ad   :  { %2971 = vpow2.f32 %v891_v5  ;;  %v895_v33 = vmul.f32 1.442695, %v880_v13  ;;  %v893_v36 = vmul.f32 1.442695, %v879_v16  ;;  %v900_v30 = vsel %vm219_vm1, %v3596_v23, 0.0 }
 0x4ae   :  { %2973 = vpow2.f32 %v889_v14  ;;  %v1448_v24 = vsel %vm219_vm1, %v3591_v21, -inf  ;;  %v1445_v25 = vsel %vm219_vm1, %v3594_v20, -inf  ;;  %v897_v27 = vsel %vm219_vm1, %v3602_v54, 0.0 }
 0x4af   :  { %1443 = vmax.xlane.f32.xlu1 %v1442_v19  ;;  %1440 = vmax.xlane.f32.xlu0 %v1439_v4  ;;  %2975 = vpow2.f32 %v895_v33  ;;  %v3086_v42 = vmov 0  }
 0x4b0   :  { %2977 = vpow2.f32 %v893_v36  ;;  %2962 = vset.pattern.permute.xlu1 %v3086_v42  ;;  %2961 = vset.pattern.permute.xlu0 %v3086_v42 }
 0x4b3   :  { %1449 = vmax.xlane.f32.xlu1 %v1448_v24  ;;  %1446 = vmax.xlane.f32.xlu0 %v1445_v25 }
 0x4b4   :  { %v3604_v28 = vpop.eup %2967 }
 0x4b5   :  { %v3610_v7 = vpop.eup %2969  ;;  %v906_v56 = vsel %vm219_vm1, %v3604_v28, 0.0 }
 0x4b6   :  { %v903_v60 = vsel %vm219_vm1, %v3610_v7, 0.0 }
 0x4b7   :  { %901 = vadd.xlane.f32.xlu1 %v900_v30  ;;  %898 = vadd.xlane.f32.xlu0 %v897_v27  ;;  %v3612_v29 = vpop.eup %2971 }
 0x4b8   :  { %v3618_v31 = vpop.eup %2973  ;;  %v912_v15 = vsel %vm219_vm1, %v3612_v29, 0.0 }
 0x4b9   :  { %v3620_v32 = vpop.eup %2975  ;;  %v909_v35 = vsel %vm219_vm1, %v3618_v31, 0.0 }
 0x4ba   :  { %v3626_v37 = vpop.eup %2977  ;;  %v918_v18 = vsel %vm219_vm1, %v3620_v32, 0.0 }
 0x4bb   :  { %907 = vadd.xlane.f32.xlu1 %v906_v56  ;;  %904 = vadd.xlane.f32.xlu0 %v903_v60  ;;  %v915_v41 = vsel %vm219_vm1, %v3626_v37, 0.0 }
 0x4bf   :  { %913 = vadd.xlane.f32.xlu1 %v912_v15  ;;  %910 = vadd.xlane.f32.xlu0 %v909_v35 }
 0x4c3   :  { %919 = vadd.xlane.f32.xlu1 %v918_v18  ;;  %916 = vadd.xlane.f32.xlu0 %v915_v41 }
 0x534   :  { %v1432_v44 = vpop.xlane.xlu1 %1431  ;;  %v1429_v45 = vpop.xlane.xlu0 %1428 }
 0x535   :  { %v1452_v46 = vsub.f32 %v3555_v38, %v1432_v44  ;;  %v1451_v47 = vsub.f32 %v3558_v39, %v1429_v45 }
 0x537   :  { %v1461_v48 = vmul.f32 1.442695, %v1452_v46  ;;  %v1459_v17 = vmul.f32 1.442695, %v1451_v47 }
 0x538   :  { %v1438_v3 = vpop.xlane.xlu1 %1437  ;;  %v1435_v49 = vpop.xlane.xlu0 %1434 }
 0x539   :  { %2979 = vpow2.f32 %v1461_v48  ;;  %v1454_v50 = vsub.f32 %v3562_v43, %v1438_v3  ;;  %v1453_v52 = vsub.f32 %v3569_v40, %v1435_v49 }
 0x53a   :  { %2981 = vpow2.f32 %v1459_v17 }
 0x53b   :  { %v1465_v58 = vmul.f32 1.442695, %v1454_v50  ;;  %v1463_v1 = vmul.f32 1.442695, %v1453_v52 }
 0x53c   :  { %v1444_v9 = vpop.xlane.xlu1 %1443  ;;  %v1441_v2 = vpop.xlane.xlu0 %1440 }
 0x53d   :  { %2983 = vpow2.f32 %v1465_v58  ;;  %v1456_v26 = vsub.f32 %v3579_v8, %v1444_v9  ;;  %v1455_v38 = vsub.f32 %v3582_v6, %v1441_v2 }
 0x53e   :  { %2985 = vpow2.f32 %v1463_v1 }
 0x53f   :  { %v1469_v39 = vmul.f32 1.442695, %v1456_v26  ;;  %v1467_v11 = vmul.f32 1.442695, %v1455_v38  ;;  %v484_v38 = vld [vmem:[%s3909_s4 + $0x38] sm:$0xff] }
 0x540   :  { %v1450_v12 = vpop.xlane.xlu1 %1449  ;;  %v1447_v5 = vpop.xlane.xlu0 %1446 }
 0x541   :  { %2987 = vpow2.f32 %v1469_v39  ;;  %v1458_v43 = vsub.f32 %v3591_v21, %v1450_v12  ;;  %v1457_v40 = vsub.f32 %v3594_v20, %v1447_v5  ;;  %v3059_v39 = vld [vmem:[%s3901_s1] sm:$0xff]  ;;  %v3061_v12 = vld [vmem:[%s3901_s1 + $0x10] sm:$0xff]  ;;  %v3062_v5 = vld [vmem:[%s3901_s1 + $0x18] sm:$0xff] }
 0x542   :  { %2989 = vpow2.f32 %v1467_v11  ;;  %v3060_v11 = vld [vmem:[%s3901_s1 + $0x8] sm:$0xff] }
 0x543   :  { %v3640_v13 = vpop.eup %2979  ;;  %v1473_v14 = vmul.f32 1.442695, %v1458_v43  ;;  %v1471_v16 = vmul.f32 1.442695, %v1457_v40  ;;  %v3063_v43 = vld [vmem:[%s3901_s1 + $0x20] sm:$0xff]  ;;  %v3064_v40 = vld [vmem:[%s3901_s1 + $0x28] sm:$0xff] }
 0x544   :  { %v3642_v19 = vpop.eup %2981  ;;  %v902_v8 = vpop.xlane.xlu1 %901  ;;  %v1478_v6 = vsel %vm219_vm1, %v3640_v13, 0.0 }
 0x545   :  { %v899_v4 = vpop.xlane.xlu0 %898  ;;  %2991 = vpow2.f32 %v1473_v14  ;;  %1479 = vadd.xlane.f32.xlu1 %v1478_v6  ;;  %v1475_v33 = vsel %vm219_vm1, %v3642_v19, 0.0  ;;  %v3065_v14 = vld [vmem:[%s3901_s1 + $0x30] sm:$0xff]  ;;  %v3069_v6 = vld [vmem:[%s3901_s1 + $0x48] sm:$0xff] }
 0x546   :  { %2993 = vpow2.f32 %v1471_v16  ;;  %1476 = vadd.xlane.f32.xlu0 %v1475_v33  ;;  %v3066_v16 = vld [vmem:[%s3901_s1 + $0x38] sm:$0xff]  ;;  %v3070_v33 = vld [vmem:[%s3901_s1 + $0x88] sm:$0xff] }
 0x547   :  { %v3648_v21 = vpop.eup %2983  ;;  %2995 = vrcp.f32 %v902_v8  ;;  %v3067_v8 = vld [vmem:[%s3901_s1 + $0x40] sm:$0xff] }
 0x548   :  { %v3650_v20 = vpop.eup %2985  ;;  %2997 = vrcp.f32 %v899_v4  ;;  %v908_v36 = vpop.xlane.xlu1 %907  ;;  %v1484_v25 = vsel %vm219_vm1, %v3648_v21, 0.0  ;;  %v3068_v4 = vld [vmem:[%s3901_s1 + $0x80] sm:$0xff] }
 0x549   :  { %v905_v24 = vpop.xlane.xlu0 %904  ;;  %2999 = vrcp.f32 %v908_v36  ;;  %1485 = vadd.xlane.f32.xlu1 %v1484_v25  ;;  %v1481_v30 = vsel %vm219_vm1, %v3650_v20, 0.0  ;;  %v3071_v36 = vld [vmem:[%s3901_s1 + $0x50] sm:$0xff]  ;;  %v3073_v25 = vld [vmem:[%s3901_s1 + $0x58] sm:$0xff] }
 0x54a   :  { %3001 = vrcp.f32 %v905_v24  ;;  %1482 = vadd.xlane.f32.xlu0 %v1481_v30  ;;  %v3072_v24 = vld [vmem:[%s3901_s1 + $0x90] sm:$0xff]  ;;  %v3074_v30 = vld [vmem:[%s3901_s1 + $0x98] sm:$0xff] }
 0x54b   :  { %v3656_v27 = vpop.eup %2987 }
 0x54c   :  { %v3658_v56 = vpop.eup %2989  ;;  %v914_v60 = vpop.xlane.xlu1 %913  ;;  %v1490_v35 = vsel %vm219_vm1, %v3656_v27, 0.0 }
 0x54d   :  { %v911_v15 = vpop.xlane.xlu0 %910  ;;  %3003 = vrcp.f32 %v914_v60  ;;  %1491 = vadd.xlane.f32.xlu1 %v1490_v35  ;;  %v1487_v18 = vsel %vm219_vm1, %v3658_v56, 0.0  ;;  %v3075_v60 = vld [vmem:[%s3901_s1 + $0x60] sm:$0xff]  ;;  %v3077_v35 = vld [vmem:[%s3901_s1 + $0x68] sm:$0xff] }
 0x54e   :  { %3005 = vrcp.f32 %v911_v15  ;;  %1488 = vadd.xlane.f32.xlu0 %v1487_v18  ;;  %v3076_v15 = vld [vmem:[%s3901_s1 + $0xa0] sm:$0xff]  ;;  %v3078_v18 = vld [vmem:[%s3901_s1 + $0xa8] sm:$0xff] }
 0x54f   :  { %v3664_v41 = vpop.eup %2991 }
 0x550   :  { %v3666_v42 = vpop.eup %2993  ;;  %v920_v44 = vpop.xlane.xlu1 %919  ;;  %v1496_v46 = vsel %vm219_vm1, %v3664_v41, 0.0 }
 0x551   :  { %v917_v45 = vpop.xlane.xlu0 %916  ;;  %v2996_v47 = vpop.eup %2995  ;;  %3007 = vrcp.f32 %v920_v44  ;;  %1497 = vadd.xlane.f32.xlu1 %v1496_v46  ;;  %v1493_v48 = vsel %vm219_vm1, %v3666_v42, 0.0  ;;  %v3079_v44 = vld [vmem:[%s3901_s1 + $0x70] sm:$0xff]  ;;  %v3081_v46 = vld [vmem:[%s3901_s1 + $0x78] sm:$0xff] }
 0x552   :  { %v2998_v17 = vpop.eup %2997  ;;  %v930_v3 = vmul.f32 %v2996_v47, %v3596_v23  ;;  %3009 = vrcp.f32 %v917_v45  ;;  %1494 = vadd.xlane.f32.xlu0 %v1493_v48  ;;  %v3080_v45 = vld [vmem:[%s3901_s1 + $0xb0] sm:$0xff]  ;;  %v3082_v47 = vld [vmem:[%s3901_s1 + $0xb8] sm:$0xff] }
 0x553   :  { %v3000_v49 = vpop.eup %2999  ;;  %v929_v50 = vmul.f32 %v2998_v17, %v3602_v54 }
 0x554   :  { %v3002_v52 = vpop.eup %3001  ;;  %v932_v1 = vmul.f32 %v3000_v49, %v3604_v28 }
 0x555   :  { %2622 = vmatprep.mubr.msk.f32.mxu1 %vm219_vm1, %v929_v50  ;;  %v931_v58 = vmul.f32 %v3002_v52, %v3610_v7 }
 0x556   :  { %2623 = vmatmul.mubr.msk.f32.vlgmr.msra.gmra.mrb[12].mxu1 %vm219_vm1, %v930_v3 }
 0x557   :  { %v3004_v9 = vpop.eup %3003  ;;  %2872 = vmatpush3.bf16.msra.mxu1 %v3424_v10  ;;  %2625 = vmatprep.mubr.msk.f32.mxu1 %vm219_vm1, %v931_v58 }
 0x558   :  { %v3006_v23 = vpop.eup %3005  ;;  %2874 = vmatprep.subr.bf16.mxu1 %v3434_v22  ;;  %v934_v54 = vmul.f32 %v3004_v9, %v3612_v29  ;;  %v478_v29 = vld [vmem:[%s3909_s4 + $0x8] sm:$0xff] }
 0x559   :  { %v933_v2 = vmul.f32 %v3006_v23, %v3618_v31  ;;  %v480_v31 = vld [vmem:[%s3909_s4 + $0x18] sm:$0xff] }
 0x55a   :  { %2626 = vmatmul.mubr.msk.f32.gmra.mrb[14].mxu1 %vm219_vm1, %v932_v1 }
 0x55b   :  { %v3008_v26 = vpop.eup %3007  ;;  %2876 = vmatpush3.bf16.msra.mxu1 %v3434_v22  ;;  %2628 = vmatprep.mubr.msk.f32.mxu1 %vm219_vm1, %v933_v2  ;;  %v479_v22 = vld [vmem:[%s3909_s4 + $0x10] sm:$0xff] }
 0x55c   :  { %v3010_v28 = vpop.eup %3009  ;;  %2878 = vmatprep.subr.bf16.mxu1 %v3441_v34  ;;  %v936_v7 = vmul.f32 %v3008_v26, %v3620_v32  ;;  %v481_v32 = vld [vmem:[%s3909_s4 + $0x20] sm:$0xff] }
 0x55d   :  { %v935_v10 = vmul.f32 %v3010_v28, %v3626_v37  ;;  %v483_v37 = vld [vmem:[%s3909_s4 + $0x30] sm:$0xff] }
 0x55e   :  { %2629 = vmatmul.mubr.msk.f32.gmra.mrb[16].mxu1 %vm219_vm1, %v934_v54 }
 0x55f   :  { %2880 = vmatpush3.bf16.msra.mxu1 %v3441_v34  ;;  %2631 = vmatprep.mubr.msk.f32.mxu1 %vm219_vm1, %v935_v10  ;;  %v477_v34 = vld [vmem:[%s3909_s4] sm:$0xff] }
 0x560   :  { %2882 = vmatprep.subr.bf16.mxu1 %v3462_v51 }
 0x562   :  { %2632 = vmatmul.mubr.msk.f32.gmra.mrb[18].mxu1 %vm219_vm1, %v936_v7  ;;  %492 = vperm.xlu1 %2962, %v478_v29  }
 0x563   :  { %2884 = vmatpush3.bf16.msra.mxu1 %v3462_v51  ;;  %v482_v51 = vld [vmem:[%s3909_s4 + $0x28] sm:$0xff] }
 0x566   :  { %497 = vperm.xlu1 %2962, %v479_v22  }
 0x568   :  { %487 = vperm.xlu0 %2961, %v477_v34  }
 0x56a   :  { %502 = vperm.xlu1 %2962, %v480_v31  }
 0x56e   :  { %507 = vperm.xlu1 %2962, %v481_v32  }
 0x572   :  { %512 = vperm.xlu1 %2962, %v482_v51  }
 0x576   :  { %517 = vperm.xlu1 %2962, %v483_v37  }
 0x57a   :  { %522 = vperm.xlu1 %2962, %v484_v38  }
 0x586   :  { %1851 = vxpose.xlu0.b32.start [1/8] (short) (narrow) %v3059_v39, 64 }
 0x58a   :  { %1852 = vxpose.xlu0.b32.cont [2/8] (short) (narrow) %v3060_v11, 64 }
 0x58e   :  { %1853 = vxpose.xlu0.b32.cont [3/8] (short) (narrow) %v3061_v12, 64 }
 0x592   :  { %1854 = vxpose.xlu0.b32.cont [4/8] (short) (narrow) %v3062_v5, 64 }
 0x596   :  { %1855 = vxpose.xlu0.b32.cont [5/8] (short) (narrow) %v3063_v43, 64 }
 0x59a   :  { %1856 = vxpose.xlu0.b32.cont [6/8] (short) (narrow) %v3064_v40, 64 }
 0x59e   :  { %1857 = vxpose.xlu0.b32.cont [7/8] (short) (narrow) %v3065_v14, 64 }
 0x5a2   :  { %1858 = vxpose.xlu0.b32.end [8/8] (short) (narrow) %v3066_v16, 64 }
 0x5a3   :  { %1690 = vxpose.xlu1.b32.start [1/8] (short) (narrow) %v3067_v8, 64 }
 0x5a6   :  { %2012 = vxpose.xlu0.b32.start [1/8] (short) (narrow) %v3068_v4, 64  ;;  %v2258_v4 = vld [vmem:[%s3910_s9] ss:$0 sm:$0xff] }
 0x5a7   :  { %1691 = vxpose.xlu1.b32.cont [2/8] (short) (narrow) %v3069_v6, 64 }
 0x5aa   :  { %2013 = vxpose.xlu0.b32.cont [2/8] (short) (narrow) %v3070_v33, 64 }
 0x5ab   :  { %1692 = vxpose.xlu1.b32.cont [3/8] (short) (narrow) %v3071_v36, 64 }
 0x5ae   :  { %2014 = vxpose.xlu0.b32.cont [3/8] (short) (narrow) %v3072_v24, 64 }
 0x5af   :  { %1693 = vxpose.xlu1.b32.cont [4/8] (short) (narrow) %v3073_v25, 64 }
 0x5b2   :  { %2015 = vxpose.xlu0.b32.cont [4/8] (short) (narrow) %v3074_v30, 64 }
 0x5b3   :  { %1694 = vxpose.xlu1.b32.cont [5/8] (short) (narrow) %v3075_v60, 64 }
 0x5b6   :  { %2016 = vxpose.xlu0.b32.cont [5/8] (short) (narrow) %v3076_v15, 64 }
 0x5b7   :  { %1695 = vxpose.xlu1.b32.cont [6/8] (short) (narrow) %v3077_v35, 64 }
 0x5ba   :  { %2017 = vxpose.xlu0.b32.cont [6/8] (short) (narrow) %v3078_v18, 64 }
 0x5bb   :  { %1696 = vxpose.xlu1.b32.cont [7/8] (short) (narrow) %v3079_v44, 64 }
 0x5be   :  { %2018 = vxpose.xlu0.b32.cont [7/8] (short) (narrow) %v3080_v45, 64 }
 0x5bf   :  { %1697 = vxpose.xlu1.b32.end [8/8] (short) (narrow) %v3081_v46, 64 }
 0x5c2   :  { %2019 = vxpose.xlu0.b32.end [8/8] (short) (narrow) %v3082_v47, 64 }
 0x5d2   :  { %v1480_v48 = vpop.xlane.xlu1 %1479 }
 0x5d3   :  { %3011 = vrcp.f32 %v1480_v48  ;;  %v1477_v17 = vpop.xlane.xlu0 %1476 }
 0x5d4   :  { %3013 = vrcp.f32 %v1477_v17 }
 0x5d6   :  { %v1486_v3 = vpop.xlane.xlu1 %1485 }
 0x5d7   :  { %3015 = vrcp.f32 %v1486_v3  ;;  %v1483_v49 = vpop.xlane.xlu0 %1482 }
 0x5d8   :  { %3017 = vrcp.f32 %v1483_v49 }
 0x5da   :  { %v1492_v50 = vpop.xlane.xlu1 %1491 }
 0x5db   :  { %3019 = vrcp.f32 %v1492_v50  ;;  %v1489_v52 = vpop.xlane.xlu0 %1488 }
 0x5dc   :  { %3021 = vrcp.f32 %v1489_v52 }
 0x5dd   :  { %v3012_v58 = vpop.eup %3011 }
 0x5de   :  { %v3014_v1 = vpop.eup %3013  ;;  %v1508_v9 = vmul.f32 %v3012_v58, %v3640_v13  ;;  %v1498_v23 = vpop.xlane.xlu1 %1497 }
 0x5df   :  { %3023 = vrcp.f32 %v1498_v23  ;;  %v1495_v2 = vpop.xlane.xlu0 %1494  ;;  %v1507_v54 = vmul.f32 %v3014_v1, %v3642_v19 }
 0x5e0   :  { %3025 = vrcp.f32 %v1495_v2 }
 0x5e1   :  { %v3016_v26 = vpop.eup %3015  ;;  %2689 = vmatprep.mubr.msk.f32.mxu1 %vm219_vm1, %v1507_v54 }
 0x5e2   :  { %v3018_v28 = vpop.eup %3017  ;;  %2690 = vmatmul.mubr.msk.f32.vlgmr.msra.gmra.mrb[20].mxu1 %vm219_vm1, %v1508_v9  ;;  %v493_v10 = vpop.permute.xlu1 %492  ;;  %v1510_v7 = vmul.f32 %v3016_v26, %v3648_v21 }
 0x5e3   :  { %v526_v29 = vmul.f32 %v3308_v53, %v493_v10  ;;  %v1509_v22 = vmul.f32 %v3018_v28, %v3650_v20 }
 0x5e5   :  { %v3020_v13 = vpop.eup %3019  ;;  %2692 = vmatprep.mubr.msk.f32.mxu1 %vm219_vm1, %v1509_v22 }
 0x5e6   :  { %v3022_v34 = vpop.eup %3021  ;;  %2693 = vmatmul.mubr.msk.f32.gmra.mrb[22].mxu1 %vm219_vm1, %v1510_v7  ;;  %v498_v19 = vpop.permute.xlu1 %497  ;;  %v1512_v31 = vmul.f32 %v3020_v13, %v3656_v27 }
 0x5e7   :  { %v527_v32 = vmul.f32 %v498_v19, %v3314_v59  ;;  %v488_v51 = vpop.permute.xlu0 %487  ;;  %v1511_v37 = vmul.f32 %v3022_v34, %v3658_v56 }
 0x5e8   :  { %v525_v21 = vmul.f32 %v488_v51, %v3310_v55 }
 0x5e9   :  { %v3024_v38 = vpop.eup %3023  ;;  %2695 = vmatprep.mubr.msk.f32.mxu1 %vm219_vm1, %v1511_v37 }
 0x5ea   :  { %v3026_v53 = vpop.eup %3025  ;;  %v3805_v20 = vpack.c.bf16 %v526_v29, %v525_v21  ;;  %2696 = vmatmul.mubr.msk.f32.gmra.mrb[24].mxu1 %vm219_vm1, %v1512_v31  ;;  %v503_v39 = vpop.permute.xlu1 %502  ;;  %v1514_v11 = vmul.f32 %v3024_v38, %v3664_v41 }
 0x5eb   :  { %v528_v27 = vmul.f32 %v3312_v57, %v503_v39  ;;  %v1513_v59 = vmul.f32 %v3026_v53, %v3666_v42 }
 0x5ed   :  { %v3811_v12 = vpack.c.bf16 %v528_v27, %v527_v32  ;;  %2698 = vmatprep.mubr.msk.f32.mxu1 %vm219_vm1, %v1513_v59 }
 0x5ee   :  { %2699 = vmatmul.mubr.msk.f32.gmra.mrb[26].mxu1 %vm219_vm1, %v1514_v11  ;;  %v508_v55 = vpop.permute.xlu1 %507 }
 0x5ef   :  { %v529_v5 = vmul.f32 %v508_v55, %v3318_v62 }
 0x5f2   :  { %v513_v56 = vpop.permute.xlu1 %512 }
 0x5f3   :  { %v530_v43 = vmul.f32 %v3316_v61, %v513_v56 }
 0x5f5   :  { %v3817_v40 = vpack.c.bf16 %v530_v43, %v529_v5 }
 0x5f6   :  { %v518_v14 = vpop.permute.xlu1 %517 }
 0x5f7   :  { %v531_v57 = vmul.f32 %v518_v14, %v3322_v0 }
 0x5fa   :  { %v523_v41 = vpop.permute.xlu1 %522 }
 0x5fb   :  { %v532_v42 = vmul.f32 %v3320_v63, %v523_v41 }
 0x5fd   :  { %v3821_v16 = vpack.c.bf16 %v532_v42, %v531_v57 }
 0x606   :  { %v3827_v2 = vpop.trf.xlu0 }
 0x60a   :  { %v1868_v31 = vpop.trf.xlu0 }
 0x60e   :  { %v1869_v43 = vpop.trf.xlu0 }
 0x623   :  { %v1706_v8 = vpop.trf.xlu1 }
 0x624   :  { %2717 = vmatprep.mubr.msk.f32.mxu1 %vm219_vm1, %v1706_v8 }
 0x627   :  { %v1707_v49 = vpop.trf.xlu1 }
 0x629   :  { %v2624_v62 = vpop.f32.mrb[12].mxu1 }
 0x62a   :  { %v1039_v6 = vadd.f32 %v2624_v62, %v2258_v4  ;;  %v1033_v61 = vpop.f32.mrb[13].mxu1 }
 0x62b   :  { %v1034_v33 = vadd.f32 %v2258_v4, %v1033_v61  ;;  %v1708_v26 = vpop.trf.xlu1 }
 0x62c   :  { %v1082_v36 = vmul.f32 1.442695, %v1039_v6  ;;  %vm1073_vm7 = vcmp.gt.f32.partialorder %v1039_v6, 0.0 }
 0x62d   :  { %v1080_v24 = vmul.f32 1.442695, %v1034_v33  ;;  %v2627_v25 = vpop.f32.mrb[14].mxu1  ;;  %vm1072_vm8 = vcmp.gt.f32.partialorder %v1034_v33, 0.0 }
 0x62e   :  { %3027 = vpow2.f32 %v1082_v36  ;;  %v1049_v0 = vadd.f32 %v2627_v25, %v2258_v4  ;;  %v1043_v30 = vpop.f32.mrb[15].mxu1 }
 0x62f   :  { %3029 = vpow2.f32 %v1080_v24  ;;  %v1044_v63 = vadd.f32 %v2258_v4, %v1043_v30  ;;  %v1709_v37 = vpop.trf.xlu1 }
 0x630   :  { %v1086_v60 = vmul.f32 1.442695, %v1049_v0  ;;  %vm1075_vm9 = vcmp.gt.f32.partialorder %v1049_v0, 0.0 }
 0x631   :  { %v1084_v15 = vmul.f32 1.442695, %v1044_v63  ;;  %v2630_v35 = vpop.f32.mrb[16].mxu1  ;;  %vm1074_vm10 = vcmp.gt.f32.partialorder %v1044_v63, 0.0 }
 0x632   :  { %3031 = vpow2.f32 %v1086_v60  ;;  %v1059_v18 = vadd.f32 %v2630_v35, %v2258_v4  ;;  %v1053_v44 = vpop.f32.mrb[17].mxu1 }
 0x633   :  { %3033 = vpow2.f32 %v1084_v15  ;;  %v1054_v45 = vadd.f32 %v2258_v4, %v1053_v44  ;;  %v1710_v41 = vpop.trf.xlu1 }
 0x634   :  { %v1090_v46 = vmul.f32 1.442695, %v1059_v18  ;;  %vm1077_vm11 = vcmp.gt.f32.partialorder %v1059_v18, 0.0 }
 0x635   :  { %v1088_v47 = vmul.f32 1.442695, %v1054_v45  ;;  %v2633_v48 = vpop.f32.mrb[18].mxu1  ;;  %vm1076_vm12 = vcmp.gt.f32.partialorder %v1054_v45, 0.0 }
 0x636   :  { %3035 = vpow2.f32 %v1090_v46  ;;  %v1069_v17 = vadd.f32 %v2633_v48, %v2258_v4  ;;  %v1063_v3 = vpop.f32.mrb[19].mxu1 }
 0x637   :  { %3037 = vpow2.f32 %v1088_v47  ;;  %v1064_v50 = vadd.f32 %v2258_v4, %v1063_v3  ;;  %v1870_v4 = vpop.trf.xlu0  ;;  %v1711_v62 = vpop.trf.xlu1 }
 0x638   :  { %v3028_v52 = vpop.eup %3027  ;;  %v1094_v58 = vmul.f32 1.442695, %v1069_v17  ;;  %vm1079_vm13 = vcmp.gt.f32.partialorder %v1069_v17, 0.0 }
 0x639   :  { %v3030_v1 = vpop.eup %3029  ;;  %v2268_v9 = vadd.f32 -1.0, %v3028_v52  ;;  %v1092_v23 = vmul.f32 1.442695, %v1064_v50  ;;  %vm1078_vm14 = vcmp.gt.f32.partialorder %v1064_v50, 0.0 }
 0x63a   :  { %v2267_v54 = vadd.f32 -1.0, %v3030_v1  ;;  %3039 = vpow2.f32 %v1094_v58 }
 0x63b   :  { %3041 = vpow2.f32 %v1092_v23  ;;  %v1105_v28 = vsel %vm1073_vm7, %v1039_v6, %v2268_v9  ;;  %v1871_v6 = vpop.trf.xlu0  ;;  %v1712_v61 = vpop.trf.xlu1 }
 0x63c   :  { %v3032_v10 = vpop.eup %3031  ;;  %v1104_v7 = vsel %vm1072_vm8, %v1034_v33, %v2267_v54 }
 0x63d   :  { %v3034_v29 = vpop.eup %3033  ;;  %v2270_v22 = vadd.f32 -1.0, %v3032_v10  ;;  %v2885_v13 = vpack.c.bf16 %v1105_v28, %v1104_v7 }
 0x63e   :  { %v2269_v34 = vadd.f32 -1.0, %v3034_v29 }
 0x63f   :  { %2886 = vmatprep.subr.bf16.mxu1 %v2885_v13  ;;  %v1107_v19 = vsel %vm1075_vm9, %v1049_v0, %v2270_v22  ;;  %v1872_v33 = vpop.trf.xlu0 }
 0x640   :  { %v3036_v32 = vpop.eup %3035  ;;  %2888 = vmatpush3.bf16.msra.mxu1 %v2885_v13  ;;  %v1106_v51 = vsel %vm1074_vm10, %v1044_v63, %v2269_v34 }
 0x641   :  { %v3038_v21 = vpop.eup %3037  ;;  %v2272_v38 = vadd.f32 -1.0, %v3036_v32  ;;  %v2889_v53 = vpack.c.bf16 %v1107_v19, %v1106_v51 }
 0x642   :  { %v2271_v39 = vadd.f32 -1.0, %v3038_v21 }
 0x643   :  { %2890 = vmatprep.subr.bf16.mxu1 %v2889_v53  ;;  %v1109_v11 = vsel %vm1077_vm11, %v1059_v18, %v2272_v38 }
 0x644   :  { %v3040_v27 = vpop.eup %3039  ;;  %2892 = vmatpush3.bf16.msra.mxu1 %v2889_v53  ;;  %v1108_v59 = vsel %vm1076_vm12, %v1054_v45, %v2271_v39 }
 0x645   :  { %v3042_v55 = vpop.eup %3041  ;;  %v2274_v56 = vadd.f32 -1.0, %v3040_v27  ;;  %v2893_v5 = vpack.c.bf16 %v1109_v11, %v1108_v59 }
 0x646   :  { %v2273_v14 = vadd.f32 -1.0, %v3042_v55 }
 0x647   :  { %2894 = vmatprep.subr.bf16.mxu1 %v2893_v5  ;;  %v1111_v57 = vsel %vm1079_vm13, %v1069_v17, %v2274_v56 }
 0x648   :  { %2896 = vmatpush3.bf16.msra.mxu1 %v2893_v5  ;;  %v1110_v42 = vsel %vm1078_vm14, %v1064_v50, %v2273_v14 }
 0x649   :  { %v2897_v8 = vpack.c.bf16 %v1111_v57, %v1110_v42 }
 0x64b   :  { %2898 = vmatprep.subr.bf16.mxu1 %v2897_v8 }
 0x64c   :  { %2900 = vmatpush3.bf16.msra.mxu1 %v2897_v8 }
 0x64d   :  { %2902 = vmatprep.subr.bf16.mxu1 %v3805_v20 }
 0x64f   :  { %2718 = vmatmul.mubr.msk.f32.vlgmr.msra.gmra.mrb[28].mxu1 %vm219_vm1, %v1707_v49 }
 0x650   :  { %2904 = vmatpush3.bf16.msra.mxu1 %v3805_v20  ;;  %2720 = vmatprep.mubr.msk.f32.mxu1 %vm219_vm1, %v1708_v26  ;;  %v1713_v20 = vpop.trf.xlu1 }
 0x651   :  { %2906 = vmatprep.subr.bf16.mxu1 %v3811_v12 }
 0x653   :  { %2721 = vmatmul.mubr.msk.f32.gmra.mrb[30].mxu1 %vm219_vm1, %v1709_v37 }
 0x654   :  { %2908 = vmatpush3.bf16.msra.mxu1 %v3811_v12  ;;  %2723 = vmatprep.mubr.msk.f32.mxu1 %vm219_vm1, %v1710_v41  ;;  %v1873_v12 = vpop.trf.xlu0 }
 0x655   :  { %2910 = vmatprep.subr.bf16.mxu1 %v3817_v40 }
 0x657   :  { %2724 = vmatmul.mubr.msk.f32.gmra.mrb[32].mxu1 %vm219_vm1, %v1711_v62 }
 0x658   :  { %2912 = vmatpush3.bf16.msra.mxu1 %v3817_v40  ;;  %2726 = vmatprep.mubr.msk.f32.mxu1 %vm219_vm1, %v1712_v61  ;;  %v1874_v40 = vpop.trf.xlu0 }
 0x659   :  { %2914 = vmatprep.subr.bf16.mxu1 %v3821_v16 }
 0x65b   :  { %2727 = vmatmul.mubr.msk.f32.gmra.mrb[34].mxu1 %vm219_vm1, %v1713_v20  ;;  %v2334_v20 = vld [vmem:[%s3912_s5] ss:$0 sm:$0xff] }
 0x65c   :  { %2916 = vmatpush3.bf16.msra.mxu1 %v3821_v16  ;;  %2745 = vmatprep.mubr.msk.f32.mxu1 %vm219_vm1, %v3827_v2  ;;  %v2028_v36 = vpop.trf.xlu0  ;;  %v2293_v16 = vld [vmem:[%s3911_s13] ss:$0 sm:$0xff] }
 0x65f   :  { %2746 = vmatmul.mubr.msk.f32.vlgmr.msra.gmra.mrb[28].mxu1 %vm219_vm1, %v1868_v31 }
 0x660   :  { %2748 = vmatprep.mubr.msk.f32.mxu1 %vm219_vm1, %v1869_v43  ;;  %v2029_v50 = vpop.trf.xlu0 }
 0x663   :  { %2749 = vmatmul.mubr.msk.f32.gmra.mrb[30].mxu1 %vm219_vm1, %v1870_v4 }
 0x664   :  { %2751 = vmatprep.mubr.msk.f32.mxu1 %vm219_vm1, %v1871_v6  ;;  %v2030_v29 = vpop.trf.xlu0 }
 0x667   :  { %2752 = vmatmul.mubr.msk.f32.gmra.mrb[32].mxu1 %vm219_vm1, %v1872_v33 }
 0x668   :  { %2754 = vmatprep.mubr.msk.f32.mxu1 %vm219_vm1, %v1873_v12  ;;  %v2031_v53 = vpop.trf.xlu0 }
 0x66b   :  { %2755 = vmatmul.mubr.msk.f32.gmra.mrb[34].mxu1 %vm219_vm1, %v1874_v40 }
 0x66c   :  { %2773 = vmatprep.mubr.msk.f32.mxu1 %vm219_vm1, %v2028_v36  ;;  %v2032_v42 = vpop.trf.xlu0 }
 0x670   :  { %v2033_v6 = vpop.trf.xlu0 }
 0x674   :  { %v2034_v61 = vpop.trf.xlu0 }
 0x678   :  { %v2035_v33 = vpop.trf.xlu0 }
 0x6b5   :  { %v2691_v24 = vpop.f32.mrb[20].mxu1 }
 0x6b6   :  { %v1617_v25 = vadd.f32 %v2691_v24, %v2293_v16  ;;  %v1611_v0 = vpop.f32.mrb[21].mxu1 }
 0x6b7   :  { %v1612_v30 = vadd.f32 %v2293_v16, %v1611_v0 }
 0x6b8   :  { %v1660_v63 = vmul.f32 1.442695, %v1617_v25  ;;  %vm1651_vm15 = vcmp.gt.f32.partialorder %v1617_v25, 0.0 }
 0x6b9   :  { %v1658_v60 = vmul.f32 1.442695, %v1612_v30  ;;  %v2694_v15 = vpop.f32.mrb[22].mxu1  ;;  %vm1650_vm0 = vcmp.gt.f32.partialorder %v1612_v30, 0.0 }
 0x6ba   :  { %3043 = vpow2.f32 %v1660_v63  ;;  %v1627_v35 = vadd.f32 %v2694_v15, %v2293_v16  ;;  %v1621_v18 = vpop.f32.mrb[23].mxu1 }
 0x6bb   :  { %3045 = vpow2.f32 %v1658_v60  ;;  %v1622_v44 = vadd.f32 %v2293_v16, %v1621_v18 }
 0x6bc   :  { %v1664_v45 = vmul.f32 1.442695, %v1627_v35  ;;  %vm1653_vm3 = vcmp.gt.f32.partialorder %v1627_v35, 0.0 }
 0x6bd   :  { %v1662_v46 = vmul.f32 1.442695, %v1622_v44  ;;  %v2697_v47 = vpop.f32.mrb[24].mxu1  ;;  %vm1652_vm4 = vcmp.gt.f32.partialorder %v1622_v44, 0.0 }
 0x6be   :  { %3047 = vpow2.f32 %v1664_v45  ;;  %v1637_v48 = vadd.f32 %v2697_v47, %v2293_v16  ;;  %v1631_v17 = vpop.f32.mrb[25].mxu1 }
 0x6bf   :  { %3049 = vpow2.f32 %v1662_v46  ;;  %v1632_v3 = vadd.f32 %v2293_v16, %v1631_v17 }
 0x6c0   :  { %v1668_v49 = vmul.f32 1.442695, %v1637_v48  ;;  %vm1655_vm5 = vcmp.gt.f32.partialorder %v1637_v48, 0.0 }
 0x6c1   :  { %v1666_v52 = vmul.f32 1.442695, %v1632_v3  ;;  %v2700_v58 = vpop.f32.mrb[26].mxu1  ;;  %vm1654_vm6 = vcmp.gt.f32.partialorder %v1632_v3, 0.0 }
 0x6c2   :  { %3051 = vpow2.f32 %v1668_v49  ;;  %v1647_v1 = vadd.f32 %v2700_v58, %v2293_v16  ;;  %v1641_v9 = vpop.f32.mrb[27].mxu1 }
 0x6c3   :  { %3053 = vpow2.f32 %v1666_v52  ;;  %v1642_v23 = vadd.f32 %v2293_v16, %v1641_v9 }
 0x6c4   :  { %v3044_v2 = vpop.eup %3043  ;;  %v1672_v54 = vmul.f32 1.442695, %v1647_v1  ;;  %vm1657_vm7 = vcmp.gt.f32.partialorder %v1647_v1, 0.0 }
 0x6c5   :  { %v3046_v26 = vpop.eup %3045  ;;  %v2303_v28 = vadd.f32 -1.0, %v3044_v2  ;;  %v1670_v10 = vmul.f32 1.442695, %v1642_v23  ;;  %vm1656_vm8 = vcmp.gt.f32.partialorder %v1642_v23, 0.0 }
 0x6c6   :  { %v2302_v7 = vadd.f32 -1.0, %v3046_v26  ;;  %3055 = vpow2.f32 %v1672_v54 }
 0x6c7   :  { %3057 = vpow2.f32 %v1670_v10  ;;  %v1683_v22 = vsel %vm1651_vm15, %v1617_v25, %v2303_v28 }
 0x6c8   :  { %v3048_v13 = vpop.eup %3047  ;;  %v1682_v34 = vsel %vm1650_vm0, %v1612_v30, %v2302_v7 }
 0x6c9   :  { %v3050_v19 = vpop.eup %3049  ;;  %v2305_v31 = vadd.f32 -1.0, %v3048_v13  ;;  %v2917_v32 = vpack.c.bf16 %v1683_v22, %v1682_v34 }
 0x6ca   :  { %v2304_v51 = vadd.f32 -1.0, %v3050_v19 }
 0x6cb   :  { %2918 = vmatprep.subr.bf16.mxu1 %v2917_v32  ;;  %v1685_v37 = vsel %vm1653_vm3, %v1627_v35, %v2305_v31 }
 0x6cc   :  { %v3052_v21 = vpop.eup %3051  ;;  %2920 = vmatpush3.bf16.msra.mxu1 %v2917_v32  ;;  %v1684_v38 = vsel %vm1652_vm4, %v1622_v44, %v2304_v51 }
 0x6cd   :  { %v3054_v39 = vpop.eup %3053  ;;  %v2307_v11 = vadd.f32 -1.0, %v3052_v21  ;;  %v2921_v27 = vpack.c.bf16 %v1685_v37, %v1684_v38 }
 0x6ce   :  { %v2306_v59 = vadd.f32 -1.0, %v3054_v39 }
 0x6cf   :  { %2922 = vmatprep.subr.bf16.mxu1 %v2921_v27  ;;  %v1687_v55 = vsel %vm1655_vm5, %v1637_v48, %v2307_v11 }
 0x6d0   :  { %v3056_v56 = vpop.eup %3055  ;;  %2924 = vmatpush3.bf16.msra.mxu1 %v2921_v27  ;;  %v1686_v5 = vsel %vm1654_vm6, %v1632_v3, %v2306_v59 }
 0x6d1   :  { %v3058_v43 = vpop.eup %3057  ;;  %v2309_v14 = vadd.f32 -1.0, %v3056_v56  ;;  %v2925_v41 = vpack.c.bf16 %v1687_v55, %v1686_v5 }
 0x6d2   :  { %v2308_v57 = vadd.f32 -1.0, %v3058_v43 }
 0x6d3   :  { %2926 = vmatprep.subr.bf16.mxu1 %v2925_v41  ;;  %v1689_v8 = vsel %vm1657_vm7, %v1647_v1, %v2309_v14 }
 0x6d4   :  { %2928 = vmatpush3.bf16.msra.mxu1 %v2925_v41  ;;  %v1688_v4 = vsel %vm1656_vm8, %v1642_v23, %v2308_v57 }
 0x6d5   :  { %v2929_v62 = vpack.c.bf16 %v1689_v8, %v1688_v4 }
 0x6d7   :  { %2930 = vmatprep.subr.bf16.mxu1 %v2929_v62 }
 0x6d8   :  { %2932 = vmatpush3.bf16.msra.mxu1 %v2929_v62 }
 0x6db   :  { %2774 = vmatmul.mubr.msk.f32.vlgmr.msra.gmra.mrb[28].mxu1 %vm219_vm1, %v2029_v50 }
 0x6dc   :  { %2776 = vmatprep.mubr.msk.f32.mxu1 %vm219_vm1, %v2030_v29 }
 0x6df   :  { %2777 = vmatmul.mubr.msk.f32.gmra.mrb[30].mxu1 %vm219_vm1, %v2031_v53 }
 0x6e0   :  { %2779 = vmatprep.mubr.msk.f32.mxu1 %vm219_vm1, %v2032_v42 }
 0x6e3   :  { %2780 = vmatmul.mubr.msk.f32.gmra.mrb[32].mxu1 %vm219_vm1, %v2033_v6 }
 0x6e4   :  { %2782 = vmatprep.mubr.msk.f32.mxu1 %vm219_vm1, %v2034_v61 }
 0x6e7   :  { %2783 = vmatmul.mubr.msk.f32.gmra.mrb[34].mxu1 %vm219_vm1, %v2035_v33 }
 0x7ae   :  { %v2775_v12 = vpop.f32.mrb[28].mxu1 }
 0x7af   :  { %v2189_v40 = vadd.f32 %v2775_v12, %v2334_v20  ;;  %v2134_v36 = vpop.f32.mrb[29].mxu1 }
 0x7b0   :  { %v2188_v16 = vadd.f32 %v2334_v20, %v2134_v36 }
 0x7b1   :  { %2197 = vst.msk [vmem:[%s3913_s14 + $0x8] sm:$0xff] %vm540_vm2, %v2189_v40 }
 0x7b2   :  { %2196 = vst.msk [vmem:[%s3913_s14] sm:$0xff] %vm540_vm2, %v2188_v16  ;;  %v2778_v24 = vpop.f32.mrb[30].mxu1 }
 0x7b3   :  { %v2191_v25 = vadd.f32 %v2778_v24, %v2334_v20  ;;  %v2144_v0 = vpop.f32.mrb[31].mxu1 }
 0x7b4   :  { %v2190_v30 = vadd.f32 %v2334_v20, %v2144_v0 }
 0x7b5   :  { %2199 = vst.msk [vmem:[%s3913_s14 + $0x18] sm:$0xff] %vm540_vm2, %v2191_v25 }
 0x7b6   :  { %2198 = vst.msk [vmem:[%s3913_s14 + $0x10] sm:$0xff] %vm540_vm2, %v2190_v30  ;;  %v2781_v63 = vpop.f32.mrb[32].mxu1 }
 0x7b7   :  { %v2193_v60 = vadd.f32 %v2781_v63, %v2334_v20  ;;  %v2154_v15 = vpop.f32.mrb[33].mxu1 }
 0x7b8   :  { %v2192_v35 = vadd.f32 %v2334_v20, %v2154_v15 }
 0x7b9   :  { %2201 = vst.msk [vmem:[%s3913_s14 + $0x28] sm:$0xff] %vm540_vm2, %v2193_v60 }
 0x7ba   :  { %2200 = vst.msk [vmem:[%s3913_s14 + $0x20] sm:$0xff] %vm540_vm2, %v2192_v35  ;;  %v2784_v18 = vpop.f32.mrb[34].mxu1 }
 0x7bb   :  { %v2195_v44 = vadd.f32 %v2784_v18, %v2334_v20  ;;  %v2164_v45 = vpop.f32.mrb[35].mxu1 }
 0x7bc   :  { %v2194_v46 = vadd.f32 %v2334_v20, %v2164_v45 }
 0x7bd   :  { %2203 = vst.msk [vmem:[%s3913_s14 + $0x38] sm:$0xff] %vm540_vm2, %v2195_v44 }
 0x7be   :  { %2202 = vst.msk [vmem:[%s3913_s14 + $0x30] sm:$0xff] %vm540_vm2, %v2194_v46 }

</bundles_post_ra>
